<compile_context>
chip_gen: v7x
topology: tpu7x:2x2x1
jax: 0.10.0
libtpu: 0.0.40
codegen_flags: <defaults>
</compile_context>

<pallas_src>
import functools
import math

import jax
import jax.numpy as jnp
from jax.experimental import pallas as pl
from jax.experimental.pallas import tpu as pltpu  # noqa: F401  (TPU backend)

NEG_INF = -1e30


# ----------------------------------------------------------------------------
# Static slab layout shared by the wrapper (packing) and the kernel (views)
# ----------------------------------------------------------------------------
def slab_layout(C, H, N, n_head):
    nhN = n_head * N
    width = ((max(nhN, C, 128) + 127) // 128) * 128      # constant-slab width
    qkv_off = 2 * H                                      # after fused up|gate
    wout_off = ((qkv_off + 5 * C + 127) // 128) * 128    # 128-lane aligned
    L = {
        "slab_w": width,
        "qkv_off": qkv_off,
        "wout_off": wout_off,
        "wrow_w": wout_off + C,
    }
    r = 0
    L["bias_row"] = r;  r += nhN        # (nhN, nhN) additive attention bias
    L["wdown_row"] = r; r += H          # (H, C)    down projection
    L["ropea_row"] = r; r += N          # (N, C)    rope coefficient A
    L["ropeb_row"] = r; r += N          # (N, C)    rope coefficient B
    L["ln1_row"] = r;   r += 8          # ln1 weight (row 0 of an 8-row slot)
    L["ln2_row"] = r;   r += 8
    L["bout_row"] = r;  r += 8          # fused output-projection bias
    L["hmask_row"] = r; r += 8          # (n_head, C) 0/1 head-column mask
    L["mconst_rows"] = r
    return L


# ----------------------------------------------------------------------------
# Pallas kernel: full Block forward, single invocation (no grid)
# ----------------------------------------------------------------------------
def block_kernel(x_ref, wrow_ref, mconst_ref, out_ref, *,
                 n_head, head_size, n_rows, hidden, out_width, L):
    C = n_head * head_size
    HS = head_size
    H = hidden
    N = n_rows
    nhN = n_head * N
    eps = 1e-5
    scale = 1.0 / math.sqrt(HS)

    def layernorm(v, w):
        # one-pass variance: the two cross-lane reductions are independent
        mu = jnp.mean(v, axis=-1, keepdims=True)
        ms = jnp.mean(v * v, axis=-1, keepdims=True)
        return (v - mu) * jax.lax.rsqrt(ms - mu * mu + eps) * w

    x = x_ref[...]                                         # (N, C)

    # ----- attention branch -----
    ln1_w = mconst_ref[L["ln1_row"]:L["ln1_row"] + 1, 0:C]
    h = layernorm(x, ln1_w)

    # Fused projection: [q | k | v | swap(q) | swap(k)]; q/k columns per head
    # are pre-permuted to [even | odd]; swap() (the RoPE partner) comes for
    # free as extra matmul columns.
    qkv = jnp.dot(h, wrow_ref[:, L["qkv_off"]:L["qkv_off"] + 5 * C],
                  preferred_element_type=jnp.float32)      # (N, 5C)
    q = qkv[:, 0 * C:1 * C]
    k = qkv[:, 1 * C:2 * C]
    v = qkv[:, 2 * C:3 * C]
    q_sw = qkv[:, 3 * C:4 * C]
    k_sw = qkv[:, 4 * C:5 * C]

    # Full-width RoPE: new = x*A + swap(x)*B.  Coefficients replicate the
    # reference's (nonstandard) formula where the pass term uses the already
    # rotated component -- do not "fix" to standard RoPE.
    coef_a = mconst_ref[L["ropea_row"]:L["ropea_row"] + N, 0:C]
    coef_b = mconst_ref[L["ropeb_row"]:L["ropeb_row"] + N, 0:C]
    q = jnp.clip(q * coef_a + q_sw * coef_b, -100.0, 100.0) * scale
    k = jnp.clip(k * coef_a + k_sw * coef_b, -100.0, 100.0)
    v = jnp.clip(v, -100.0, 100.0)

    # Head-batched attention without lane shuffles:
    #   row block h of the stacked tensors handles head h; q/v are masked to
    #   head h's columns, k is just replicated; everything else (cross-head,
    #   cross-batch, non-causal) is killed by the precomputed additive bias.
    hmask = mconst_ref[L["hmask_row"]:L["hmask_row"] + n_head, 0:C]   # (nh, C)
    q_sel = jnp.concatenate(
        [q * hmask[hh:hh + 1, :] for hh in range(n_head)], axis=0)    # (nhN, C)
    k_rep = jnp.concatenate([k] * n_head, axis=0)                     # (nhN, C)

    s = jax.lax.dot_general(q_sel, k_rep, (((1,), (1,)), ((), ())),
                            preferred_element_type=jnp.float32)       # (nhN, nhN)
    s = s + mconst_ref[L["bias_row"]:L["bias_row"] + nhN, 0:nhN]      # additive mask
    s = s - jnp.max(s, axis=-1, keepdims=True)
    p = jnp.exp(s)
    p = p * pl.reciprocal(jnp.sum(p, axis=-1, keepdims=True), approx=True)

    v_sel = jnp.concatenate(
        [v * hmask[hh:hh + 1, :] for hh in range(n_head)], axis=0)    # (nhN, C)
    y_st = jnp.dot(p, v_sel, preferred_element_type=jnp.float32)      # (nhN, C)

    # Heads live in disjoint column blocks -> summing the sublane row-blocks
    # is exactly the head concat (sublane-aligned slices, 3 vadds).
    y = y_st[0:N, :]
    for hh in range(1, n_head):
        y = y + y_st[hh * N:(hh + 1) * N, :]

    # Folded c_proj -> compression -> expansion (single matmul + bias).
    b_out = mconst_ref[L["bout_row"]:L["bout_row"] + 1, 0:C]
    attn = jnp.dot(y, wrow_ref[:, L["wout_off"]:L["wout_off"] + C],
                   preferred_element_type=jnp.float32) + b_out
    x = x + attn                                           # residual (scale=1.0)

    # ----- MLP branch (SwiGLU) -----
    ln2_w = mconst_ref[L["ln2_row"]:L["ln2_row"] + 1, 0:C]
    h2 = layernorm(x, ln2_w)
    ug = jnp.dot(h2, wrow_ref[:, 0:2 * H],
                 preferred_element_type=jnp.float32)       # (N, 2H)
    up = ug[:, :H]
    gate = ug[:, H:]
    silu = gate * pl.reciprocal(1.0 + jnp.exp(-gate), approx=True)
    w_down = mconst_ref[L["wdown_row"]:L["wdown_row"] + H, 0:C]
    mlp = jnp.dot(up * silu, w_down, preferred_element_type=jnp.float32)

    # TODO(synk): dropout is identity (p=0 / eval); torch.isnan runtime warnings omitted.
    res = x + mlp                                          # (N, C)
    if out_width > C:                                      # lane-dense store
        pad = jnp.zeros((N, out_width - C), jnp.float32)
        res = jnp.concatenate([res, pad], axis=1)
    out_ref[...] = res.astype(out_ref.dtype)


# ----------------------------------------------------------------------------
# Wrapper: all weight folding / packing / layout work happens here
# ----------------------------------------------------------------------------
@functools.partial(jax.jit, static_argnums=(4,))
def block_pallas(x, params, cos, sin, n_head):
    B, T, C = x.shape
    HS = C // n_head
    H = params["w_up"].shape[0]
    N = B * T
    nhN = n_head * N
    L = slab_layout(C, H, N, n_head)

    # q/k per-head column permutations: [even | odd] and half-swapped [odd | even].
    perm_head = jnp.concatenate([jnp.arange(0, HS, 2), jnp.arange(1, HS, 2)])
    swap_head = jnp.concatenate([jnp.arange(1, HS, 2), jnp.arange(0, HS, 2)])
    perm = jnp.concatenate([hh * HS + perm_head for hh in range(n_head)])
    perm_sw = jnp.concatenate([hh * HS + swap_head for hh in range(n_head)])

    wqkv_t = params["w_attn"].T                              # (C, 3C)
    wq, wk, wv = wqkv_t[:, :C], wqkv_t[:, C:2 * C], wqkv_t[:, 2 * C:]
    wqkv_ext = jnp.concatenate(
        [wq[:, perm], wk[:, perm], wv, wq[:, perm_sw], wk[:, perm_sw]], axis=1)  # (C, 5C)

    # Fold c_proj -> compression -> expansion into one weight + bias.
    w_out = params["w_cproj"].T @ params["w_comp"].T @ params["w_exp"].T   # (C, C)
    b_out = params["b_comp"] @ params["w_exp"].T + params["b_exp"]         # (C,)

    w_upgate = jnp.concatenate([params["w_up"].T, params["w_gate"].T], axis=1)  # (C, 2H)
    w_down_t = params["w_down"].T                                               # (H, C)

    # 48-row weight slab: [upgate | qkv_ext | pad | w_out]; all starts 128-aligned.
    wrow = jnp.zeros((C, L["wrow_w"]), jnp.float32)
    wrow = wrow.at[:, 0:2 * H].set(w_upgate)
    wrow = wrow.at[:, L["qkv_off"]:L["qkv_off"] + 5 * C].set(wqkv_ext)
    wrow = wrow.at[:, L["wout_off"]:L["wout_off"] + C].set(w_out)

    # RoPE as elementwise coefficients on the permuted [rot | pass] layout:
    #   new_rot  = r*cos - p*sin
    #   new_pass = p*cos + new_rot*sin = r*(sin*cos) + p*(cos - sin^2)
    a_head = jnp.concatenate([cos, cos - sin * sin], axis=1)   # (T, HS)
    b_head = jnp.concatenate([-sin, cos * sin], axis=1)        # (T, HS)
    coef_a = jnp.tile(a_head, (B, n_head))                     # (N, C)
    coef_b = jnp.tile(b_head, (B, n_head))

    # Per-head column mask (0/1) for the stacked-head formulation.
    hmask = (jnp.arange(C)[None, :] // HS ==
             jnp.arange(n_head)[:, None]).astype(jnp.float32)  # (nh, C)

    # Stacked additive attention bias: rows/cols indexed (head, batch, time);
    # valid iff same head AND same batch AND causal.
    ridx = jnp.arange(nhN)
    head_i = ridx // N
    batch_i = (ridx % N) // T
    time_i = ridx % T
    valid = ((head_i[:, None] == head_i[None, :]) &
             (batch_i[:, None] == batch_i[None, :]) &
             (time_i[:, None] >= time_i[None, :]))
    bias = jnp.where(valid, 0.0, NEG_INF).astype(jnp.float32)  # (nhN, nhN)

    # Packed constant slab (width 128, lane-dense).
    W = L["slab_w"]
    mconst = jnp.zeros((L["mconst_rows"], W), jnp.float32)
    mconst = mconst.at[L["bias_row"]:L["bias_row"] + nhN, 0:nhN].set(bias)
    mconst = mconst.at[L["wdown_row"]:L["wdown_row"] + H, 0:C].set(w_down_t)
    mconst = mconst.at[L["ropea_row"]:L["ropea_row"] + N, 0:C].set(coef_a)
    mconst = mconst.at[L["ropeb_row"]:L["ropeb_row"] + N, 0:C].set(coef_b)
    mconst = mconst.at[L["ln1_row"], 0:C].set(params["ln1_w"])
    mconst = mconst.at[L["ln2_row"], 0:C].set(params["ln2_w"])
    mconst = mconst.at[L["bout_row"], 0:C].set(b_out)
    mconst = mconst.at[L["hmask_row"]:L["hmask_row"] + n_head, 0:C].set(hmask)

    out_w = 128   # lane-dense output store, sliced back to C below
    kernel = functools.partial(block_kernel, n_head=n_head, head_size=HS,
                               n_rows=N, hidden=H, out_width=out_w, L=L)

    out_pad = pl.pallas_call(
        kernel,
        out_shape=jax.ShapeDtypeStruct((N, out_w), jnp.float32),
    )(x.reshape(N, C), wrow, mconst)
    return out_pad[:, :C].reshape(B, T, C)


# ----------------------------------------------------------------------------
# Pure-JAX reference (mirrors the PyTorch forward exactly)
# ----------------------------------------------------------------------------
def apply_rope_ref(x, cos, sin):                               # x: (B, NH, T, HS)
    xr = x[..., 0::2]
    xp = x[..., 1::2]
    c = cos[None, None, :, :]
    s = sin[None, None, :, :]
    nr = xr * c - xp * s
    npas = xp * c + nr * s                                     # uses UPDATED rot term
    return jnp.stack([nr, npas], axis=-1).reshape(x.shape)


def block_reference(x, p, cos, sin, n_head):
    B, T, C = x.shape
    HS = C // n_head

    def ln(v, w):
        mu = v.mean(-1, keepdims=True)
        var = ((v - mu) ** 2).mean(-1, keepdims=True)
        return (v - mu) / jnp.sqrt(var + 1e-5) * w

    h = ln(x, p["ln1_w"])
    qkv = h @ p["w_attn"].T
    q, k, v = jnp.split(qkv, 3, axis=-1)

    def heads(t):
        return t.reshape(B, T, n_head, HS).transpose(0, 2, 1, 3)

    q, k, v = heads(q), heads(k), heads(v)
    q = jnp.clip(apply_rope_ref(q, cos, sin), -100.0, 100.0)
    k = jnp.clip(apply_rope_ref(k, cos, sin), -100.0, 100.0)
    v = jnp.clip(v, -100.0, 100.0)

    att = (q @ jnp.swapaxes(k, -1, -2)) * (1.0 / math.sqrt(HS))
    mask = jnp.tril(jnp.ones((T, T), bool))
    att = jnp.where(mask, att, NEG_INF)
    att = jax.nn.softmax(att, axis=-1)
    y = att @ v
    y = y.transpose(0, 2, 1, 3).reshape(B, T, C)

    y = y @ p["w_cproj"].T
    y = (y @ p["w_comp"].T + p["b_comp"]) @ p["w_exp"].T + p["b_exp"]
    x = x + y

    h2 = ln(x, p["ln2_w"])
    up = h2 @ p["w_up"].T
    gate = h2 @ p["w_gate"].T
    gate = gate * jax.nn.sigmoid(gate)
    mlp = (up * gate) @ p["w_down"].T
    return x + mlp


# ----------------------------------------------------------------------------
# Deterministic parameter init + RoPE cache
# ----------------------------------------------------------------------------
def init_params(key, C, n_layer, hidden):
    C2 = C // 2
    scale = 0.02
    resid_scale = scale / math.sqrt(2 * n_layer)
    ks = jax.random.split(key, 12)
    n = lambda k, shape, s: s * jax.random.normal(k, shape, jnp.float32)
    return {
        "ln1_w": 1.0 + 0.1 * jax.random.normal(ks[0], (C,), jnp.float32),
        "ln2_w": 1.0 + 0.1 * jax.random.normal(ks[1], (C,), jnp.float32),
        "w_attn": n(ks[2], (3 * C, C), scale),
        "w_cproj": n(ks[3], (C, C), resid_scale),
        "w_comp": n(ks[4], (C2, C), scale),
        "b_comp": n(ks[5], (C2,), scale),
        "w_exp": n(ks[6], (C, C2), scale),
        "b_exp": n(ks[7], (C,), scale),
        "w_up": n(ks[8], (hidden, C), scale),
        "w_gate": n(ks[9], (hidden, C), scale),
        "w_down": n(ks[10], (C, hidden), resid_scale),
    }


def rope_cache(head_size, T, theta=10000.0):
    seq_len = max(T, 32)
    pos = jnp.arange(seq_len, dtype=jnp.float32)
    dim_pos = jnp.arange(0, head_size, 2, dtype=jnp.float32)
    freq = 1.0 / (theta ** (dim_pos / head_size))
    angles = jnp.outer(pos, freq)
    return jnp.cos(angles)[:T], jnp.sin(angles)[:T]


if __name__ == "__main__":
    B, T, C = 2, 16, 48
    n_head, n_layer = 4, 2
    hidden = int(4 * C * 4 / 3)            # 256 (SwiGLU hidden dim)
    HS = C // n_head

    key = jax.random.PRNGKey(0)
    kx, kp = jax.random.split(key)
    x = jax.random.normal(kx, (B, T, C), jnp.float32)
    params = init_params(kp, C, n_layer, hidden)
    cos, sin = rope_cache(HS, T)

    out = jax.block_until_ready(block_pallas(x, params, cos, sin, n_head))
    ref = jax.block_until_ready(block_reference(x, params, cos, sin, n_head))
    assert out.shape == (B, T, C)
    max_err = float(jnp.max(jnp.abs(out - ref)))
    assert jnp.allclose(out, ref, rtol=2e-3, atol=2e-3), max_err
    print("KERNEL_OK")
</pallas_src>

<mosaic_0001>
module attributes {stable_mosaic.version = 11 : i64} {
  func.func @block_kernel(%arg0: memref<32x48xf32, #tpu.memory_space<vmem>>, %arg1: memref<48x816xf32, #tpu.memory_space<vmem>>, %arg2: memref<480x128xf32, #tpu.memory_space<vmem>>, %arg3: memref<32x128xf32, #tpu.memory_space<vmem>>) attributes {dimension_semantics = [], scalar_prefetch = 0 : i64, scratch_operands = 0 : i64, tpu.core_type = #tpu.core_type<tc>} {
    %c0 = arith.constant 0 : index
    %c0_0 = arith.constant 0 : index
    %0 = vector.load %arg0[%c0, %c0_0] : memref<32x48xf32, #tpu.memory_space<vmem>>, vector<32x48xf32>
    %c448 = arith.constant 448 : index
    %c0_1 = arith.constant 0 : index
    %1 = vector.load %arg2[%c448, %c0_1] : memref<480x128xf32, #tpu.memory_space<vmem>>, vector<1x48xf32>
    %cst = arith.constant dense<0.000000e+00> : vector<32xf32>
    %2 = vector.multi_reduction <add>, %0, %cst [1] : vector<32x48xf32> to vector<32xf32>
    %3 = vector.shape_cast %2 : vector<32xf32> to vector<32x1xf32>
    %cst_2 = arith.constant 4.800000e+01 : f32
    %4 = vector.broadcast %cst_2 : f32 to vector<32x1xf32>
    %5 = arith.divf %3, %4 : vector<32x1xf32>
    %6 = arith.mulf %0, %0 : vector<32x48xf32>
    %cst_3 = arith.constant dense<0.000000e+00> : vector<32xf32>
    %7 = vector.multi_reduction <add>, %6, %cst_3 [1] : vector<32x48xf32> to vector<32xf32>
    %8 = vector.shape_cast %7 : vector<32xf32> to vector<32x1xf32>
    %cst_4 = arith.constant 4.800000e+01 : f32
    %9 = vector.broadcast %cst_4 : f32 to vector<32x1xf32>
    %10 = arith.divf %8, %9 : vector<32x1xf32>
    %11 = vector.broadcast %5 : vector<32x1xf32> to vector<32x48xf32>
    %12 = arith.subf %0, %11 : vector<32x48xf32>
    %13 = arith.mulf %5, %5 : vector<32x1xf32>
    %14 = arith.subf %10, %13 : vector<32x1xf32>
    %cst_5 = arith.constant 9.99999974E-6 : f32
    %15 = vector.broadcast %cst_5 : f32 to vector<32x1xf32>
    %16 = arith.addf %14, %15 : vector<32x1xf32>
    %17 = math.rsqrt %16 : vector<32x1xf32>
    %18 = vector.broadcast %17 : vector<32x1xf32> to vector<32x48xf32>
    %19 = arith.mulf %12, %18 : vector<32x48xf32>
    %20 = vector.broadcast %1 : vector<1x48xf32> to vector<32x48xf32>
    %21 = arith.mulf %19, %20 : vector<32x48xf32>
    %c0_6 = arith.constant 0 : index
    %c512 = arith.constant 512 : index
    %22 = vector.load %arg1[%c0_6, %c512] : memref<48x816xf32, #tpu.memory_space<vmem>>, vector<48x240xf32>
    %cst_7 = arith.constant dense<0.000000e+00> : vector<32x240xf32>
    %23 = tpu.matmul %21, %22, %cst_7 {dimension_numbers = #tpu.dot_dimension_numbers<[1], [0], [0], [1], [0, 0, 1, 1], [], []>} : vector<32x48xf32>, vector<48x240xf32>, vector<32x240xf32> -> vector<32x240xf32>
    %24 = vector.extract_strided_slice %23 {offsets = [0, 0], sizes = [32, 48], strides = [1, 1]} : vector<32x240xf32> to vector<32x48xf32>
    %25 = vector.extract_strided_slice %23 {offsets = [0, 48], sizes = [32, 48], strides = [1, 1]} : vector<32x240xf32> to vector<32x48xf32>
    %26 = vector.extract_strided_slice %23 {offsets = [0, 96], sizes = [32, 48], strides = [1, 1]} : vector<32x240xf32> to vector<32x48xf32>
    %27 = vector.extract_strided_slice %23 {offsets = [0, 144], sizes = [32, 48], strides = [1, 1]} : vector<32x240xf32> to vector<32x48xf32>
    %28 = vector.extract_strided_slice %23 {offsets = [0, 192], sizes = [32, 48], strides = [1, 1]} : vector<32x240xf32> to vector<32x48xf32>
    %c384 = arith.constant 384 : index
    %c0_8 = arith.constant 0 : index
    %29 = vector.load %arg2[%c384, %c0_8] : memref<480x128xf32, #tpu.memory_space<vmem>>, vector<32x48xf32>
    %c416 = arith.constant 416 : index
    %c0_9 = arith.constant 0 : index
    %30 = vector.load %arg2[%c416, %c0_9] : memref<480x128xf32, #tpu.memory_space<vmem>>, vector<32x48xf32>
    %31 = arith.mulf %24, %29 : vector<32x48xf32>
    %32 = arith.mulf %27, %30 : vector<32x48xf32>
    %33 = arith.addf %31, %32 : vector<32x48xf32>
    %cst_10 = arith.constant -1.000000e+02 : f32
    %cst_11 = arith.constant 1.000000e+02 : f32
    %34 = vector.broadcast %cst_10 : f32 to vector<32x48xf32>
    %35 = arith.maximumf %34, %33 : vector<32x48xf32>
    %36 = vector.broadcast %cst_11 : f32 to vector<32x48xf32>
    %37 = arith.minimumf %36, %35 : vector<32x48xf32>
    %cst_12 = arith.constant 0.288675129 : f32
    %38 = vector.broadcast %cst_12 : f32 to vector<32x48xf32>
    %39 = arith.mulf %37, %38 : vector<32x48xf32>
    %40 = arith.mulf %25, %29 : vector<32x48xf32>
    %41 = arith.mulf %28, %30 : vector<32x48xf32>
    %42 = arith.addf %40, %41 : vector<32x48xf32>
    %cst_13 = arith.constant -1.000000e+02 : f32
    %cst_14 = arith.constant 1.000000e+02 : f32
    %43 = vector.broadcast %cst_13 : f32 to vector<32x48xf32>
    %44 = arith.maximumf %43, %42 : vector<32x48xf32>
    %45 = vector.broadcast %cst_14 : f32 to vector<32x48xf32>
    %46 = arith.minimumf %45, %44 : vector<32x48xf32>
    %cst_15 = arith.constant -1.000000e+02 : f32
    %cst_16 = arith.constant 1.000000e+02 : f32
    %47 = vector.broadcast %cst_15 : f32 to vector<32x48xf32>
    %48 = arith.maximumf %47, %26 : vector<32x48xf32>
    %49 = vector.broadcast %cst_16 : f32 to vector<32x48xf32>
    %50 = arith.minimumf %49, %48 : vector<32x48xf32>
    %c472 = arith.constant 472 : index
    %c0_17 = arith.constant 0 : index
    %51 = vector.load %arg2[%c472, %c0_17] : memref<480x128xf32, #tpu.memory_space<vmem>>, vector<4x48xf32>
    %52 = vector.extract_strided_slice %51 {offsets = [0, 0], sizes = [1, 48], strides = [1, 1]} : vector<4x48xf32> to vector<1x48xf32>
    %53 = vector.broadcast %52 : vector<1x48xf32> to vector<32x48xf32>
    %54 = arith.mulf %39, %53 : vector<32x48xf32>
    %55 = vector.extract_strided_slice %51 {offsets = [1, 0], sizes = [1, 48], strides = [1, 1]} : vector<4x48xf32> to vector<1x48xf32>
    %56 = vector.broadcast %55 : vector<1x48xf32> to vector<32x48xf32>
    %57 = arith.mulf %39, %56 : vector<32x48xf32>
    %58 = vector.extract_strided_slice %51 {offsets = [2, 0], sizes = [1, 48], strides = [1, 1]} : vector<4x48xf32> to vector<1x48xf32>
    %59 = vector.broadcast %58 : vector<1x48xf32> to vector<32x48xf32>
    %60 = arith.mulf %39, %59 : vector<32x48xf32>
    %61 = vector.extract_strided_slice %51 {offsets = [3, 0], sizes = [1, 48], strides = [1, 1]} : vector<4x48xf32> to vector<1x48xf32>
    %62 = vector.broadcast %61 : vector<1x48xf32> to vector<32x48xf32>
    %63 = arith.mulf %39, %62 : vector<32x48xf32>
    %64 = tpu.concatenate %54, %57, %60, %63 in 0 : vector<32x48xf32>, vector<32x48xf32>, vector<32x48xf32>, vector<32x48xf32> -> vector<128x48xf32>
    %65 = tpu.concatenate %46, %46, %46, %46 in 0 : vector<32x48xf32>, vector<32x48xf32>, vector<32x48xf32>, vector<32x48xf32> -> vector<128x48xf32>
    %cst_18 = arith.constant dense<0.000000e+00> : vector<128x128xf32>
    %66 = tpu.matmul %64, %65, %cst_18 {dimension_numbers = #tpu.dot_dimension_numbers<[1], [1], [0], [0], [0, 0, 1, 0], [], []>} : vector<128x48xf32>, vector<128x48xf32>, vector<128x128xf32> -> vector<128x128xf32>
    %c0_19 = arith.constant 0 : index
    %c0_20 = arith.constant 0 : index
    %67 = vector.load %arg2[%c0_19, %c0_20] : memref<480x128xf32, #tpu.memory_space<vmem>>, vector<128x128xf32>
    %68 = arith.addf %66, %67 : vector<128x128xf32>
    %cst_21 = arith.constant dense<0xFF800000> : vector<128xf32>
    %69 = vector.multi_reduction <maximumf>, %68, %cst_21 [1] : vector<128x128xf32> to vector<128xf32>
    %70 = vector.shape_cast %69 : vector<128xf32> to vector<128x1xf32>
    %71 = vector.broadcast %70 : vector<128x1xf32> to vector<128x128xf32>
    %72 = arith.subf %68, %71 : vector<128x128xf32>
    %73 = math.exp %72 : vector<128x128xf32>
    %cst_22 = arith.constant dense<0.000000e+00> : vector<128xf32>
    %74 = vector.multi_reduction <add>, %73, %cst_22 [1] : vector<128x128xf32> to vector<128xf32>
    %75 = vector.shape_cast %74 : vector<128xf32> to vector<128x1xf32>
    %76 = tpu.reciprocal %75 {approx = true} : vector<128x1xf32> -> vector<128x1xf32>
    %77 = vector.broadcast %76 : vector<128x1xf32> to vector<128x128xf32>
    %78 = arith.mulf %73, %77 : vector<128x128xf32>
    %79 = vector.extract_strided_slice %51 {offsets = [0, 0], sizes = [1, 48], strides = [1, 1]} : vector<4x48xf32> to vector<1x48xf32>
    %80 = vector.broadcast %79 : vector<1x48xf32> to vector<32x48xf32>
    %81 = arith.mulf %50, %80 : vector<32x48xf32>
    %82 = vector.extract_strided_slice %51 {offsets = [1, 0], sizes = [1, 48], strides = [1, 1]} : vector<4x48xf32> to vector<1x48xf32>
    %83 = vector.broadcast %82 : vector<1x48xf32> to vector<32x48xf32>
    %84 = arith.mulf %50, %83 : vector<32x48xf32>
    %85 = vector.extract_strided_slice %51 {offsets = [2, 0], sizes = [1, 48], strides = [1, 1]} : vector<4x48xf32> to vector<1x48xf32>
    %86 = vector.broadcast %85 : vector<1x48xf32> to vector<32x48xf32>
    %87 = arith.mulf %50, %86 : vector<32x48xf32>
    %88 = vector.extract_strided_slice %51 {offsets = [3, 0], sizes = [1, 48], strides = [1, 1]} : vector<4x48xf32> to vector<1x48xf32>
    %89 = vector.broadcast %88 : vector<1x48xf32> to vector<32x48xf32>
    %90 = arith.mulf %50, %89 : vector<32x48xf32>
    %91 = tpu.concatenate %81, %84, %87, %90 in 0 : vector<32x48xf32>, vector<32x48xf32>, vector<32x48xf32>, vector<32x48xf32> -> vector<128x48xf32>
    %cst_23 = arith.constant dense<0.000000e+00> : vector<128x48xf32>
    %92 = tpu.matmul %78, %91, %cst_23 {dimension_numbers = #tpu.dot_dimension_numbers<[1], [0], [0], [1], [0, 0, 1, 1], [], []>} : vector<128x128xf32>, vector<128x48xf32>, vector<128x48xf32> -> vector<128x48xf32>
    %93 = vector.extract_strided_slice %92 {offsets = [0, 0], sizes = [32, 48], strides = [1, 1]} : vector<128x48xf32> to vector<32x48xf32>
    %94 = vector.extract_strided_slice %92 {offsets = [32, 0], sizes = [32, 48], strides = [1, 1]} : vector<128x48xf32> to vector<32x48xf32>
    %95 = arith.addf %93, %94 : vector<32x48xf32>
    %96 = vector.extract_strided_slice %92 {offsets = [64, 0], sizes = [32, 48], strides = [1, 1]} : vector<128x48xf32> to vector<32x48xf32>
    %97 = arith.addf %95, %96 : vector<32x48xf32>
    %98 = vector.extract_strided_slice %92 {offsets = [96, 0], sizes = [32, 48], strides = [1, 1]} : vector<128x48xf32> to vector<32x48xf32>
    %99 = arith.addf %97, %98 : vector<32x48xf32>
    %c464 = arith.constant 464 : index
    %c0_24 = arith.constant 0 : index
    %100 = vector.load %arg2[%c464, %c0_24] : memref<480x128xf32, #tpu.memory_space<vmem>>, vector<1x48xf32>
    %c0_25 = arith.constant 0 : index
    %c768 = arith.constant 768 : index
    %101 = vector.load %arg1[%c0_25, %c768] : memref<48x816xf32, #tpu.memory_space<vmem>>, vector<48x48xf32>
    %cst_26 = arith.constant dense<0.000000e+00> : vector<32x48xf32>
    %102 = tpu.matmul %99, %101, %cst_26 {dimension_numbers = #tpu.dot_dimension_numbers<[1], [0], [0], [1], [0, 0, 1, 1], [], []>} : vector<32x48xf32>, vector<48x48xf32>, vector<32x48xf32> -> vector<32x48xf32>
    %103 = vector.broadcast %100 : vector<1x48xf32> to vector<32x48xf32>
    %104 = arith.addf %102, %103 : vector<32x48xf32>
    %105 = arith.addf %0, %104 : vector<32x48xf32>
    %c456 = arith.constant 456 : index
    %c0_27 = arith.constant 0 : index
    %106 = vector.load %arg2[%c456, %c0_27] : memref<480x128xf32, #tpu.memory_space<vmem>>, vector<1x48xf32>
    %cst_28 = arith.constant dense<0.000000e+00> : vector<32xf32>
    %107 = vector.multi_reduction <add>, %105, %cst_28 [1] : vector<32x48xf32> to vector<32xf32>
    %108 = vector.shape_cast %107 : vector<32xf32> to vector<32x1xf32>
    %cst_29 = arith.constant 4.800000e+01 : f32
    %109 = vector.broadcast %cst_29 : f32 to vector<32x1xf32>
    %110 = arith.divf %108, %109 : vector<32x1xf32>
    %111 = arith.mulf %105, %105 : vector<32x48xf32>
    %cst_30 = arith.constant dense<0.000000e+00> : vector<32xf32>
    %112 = vector.multi_reduction <add>, %111, %cst_30 [1] : vector<32x48xf32> to vector<32xf32>
    %113 = vector.shape_cast %112 : vector<32xf32> to vector<32x1xf32>
    %cst_31 = arith.constant 4.800000e+01 : f32
    %114 = vector.broadcast %cst_31 : f32 to vector<32x1xf32>
    %115 = arith.divf %113, %114 : vector<32x1xf32>
    %116 = vector.broadcast %110 : vector<32x1xf32> to vector<32x48xf32>
    %117 = arith.subf %105, %116 : vector<32x48xf32>
    %118 = arith.mulf %110, %110 : vector<32x1xf32>
    %119 = arith.subf %115, %118 : vector<32x1xf32>
    %cst_32 = arith.constant 9.99999974E-6 : f32
    %120 = vector.broadcast %cst_32 : f32 to vector<32x1xf32>
    %121 = arith.addf %119, %120 : vector<32x1xf32>
    %122 = math.rsqrt %121 : vector<32x1xf32>
    %123 = vector.broadcast %122 : vector<32x1xf32> to vector<32x48xf32>
    %124 = arith.mulf %117, %123 : vector<32x48xf32>
    %125 = vector.broadcast %106 : vector<1x48xf32> to vector<32x48xf32>
    %126 = arith.mulf %124, %125 : vector<32x48xf32>
    %c0_33 = arith.constant 0 : index
    %c0_34 = arith.constant 0 : index
    %127 = vector.load %arg1[%c0_33, %c0_34] : memref<48x816xf32, #tpu.memory_space<vmem>>, vector<48x512xf32>
    %cst_35 = arith.constant dense<0.000000e+00> : vector<32x512xf32>
    %128 = tpu.matmul %126, %127, %cst_35 {dimension_numbers = #tpu.dot_dimension_numbers<[1], [0], [0], [1], [0, 0, 1, 1], [], []>} : vector<32x48xf32>, vector<48x512xf32>, vector<32x512xf32> -> vector<32x512xf32>
    %129 = vector.extract_strided_slice %128 {offsets = [0, 0], sizes = [32, 256], strides = [1, 1]} : vector<32x512xf32> to vector<32x256xf32>
    %130 = vector.extract_strided_slice %128 {offsets = [0, 256], sizes = [32, 256], strides = [1, 1]} : vector<32x512xf32> to vector<32x256xf32>
    %cst_36 = arith.constant 0.000000e+00 : f32
    %131 = vector.broadcast %cst_36 : f32 to vector<32x256xf32>
    %132 = arith.subf %131, %130 : vector<32x256xf32>
    %133 = math.exp %132 : vector<32x256xf32>
    %cst_37 = arith.constant 1.000000e+00 : f32
    %134 = vector.broadcast %cst_37 : f32 to vector<32x256xf32>
    %135 = arith.addf %134, %133 : vector<32x256xf32>
    %136 = tpu.reciprocal %135 {approx = true} : vector<32x256xf32> -> vector<32x256xf32>
    %137 = arith.mulf %130, %136 : vector<32x256xf32>
    %c128 = arith.constant 128 : index
    %c0_38 = arith.constant 0 : index
    %138 = vector.load %arg2[%c128, %c0_38] : memref<480x128xf32, #tpu.memory_space<vmem>>, vector<256x48xf32>
    %139 = arith.mulf %129, %137 : vector<32x256xf32>
    %cst_39 = arith.constant dense<0.000000e+00> : vector<32x48xf32>
    %140 = tpu.matmul %139, %138, %cst_39 {dimension_numbers = #tpu.dot_dimension_numbers<[1], [0], [0], [1], [0, 0, 1, 1], [], []>} : vector<32x256xf32>, vector<256x48xf32>, vector<32x48xf32> -> vector<32x48xf32>
    %141 = arith.addf %105, %140 : vector<32x48xf32>
    %cst_40 = arith.constant 0.000000e+00 : f32
    %142 = vector.broadcast %cst_40 : f32 to vector<32x80xf32>
    %143 = tpu.concatenate %141, %142 in 1 : vector<32x48xf32>, vector<32x80xf32> -> vector<32x128xf32>
    %c0_41 = arith.constant 0 : index
    %c0_42 = arith.constant 0 : index
    %144 = vector.load %arg3[%c0_41, %c0_42] : memref<32x128xf32, #tpu.memory_space<vmem>>, vector<32x128xf32>
    tpu.vector_store %arg3[%c0_41, %c0_42], %143 {strides = array<i32>} : memref<32x128xf32, #tpu.memory_space<vmem>>, vector<32x128xf32>,
    return
  }
}

</mosaic_0001>

<bundles_post_ra>
// kernel: tile.13
= control target key start
LH: loop header
LB: loop body
LE: loop exit
PB: predicated region body
PF: predicated region fallthrough
CT: control target
= control target key end

     0   :  { %s376_s0 = inlined_call_operand.vmem [shape: f32[16,12], index: 0, kind: input, shape index: {}]   ;;  %s377_s1 = inlined_call_operand.vmem [shape: f32[2,16,4,12], index: 1, kind: output, shape index: {}]  }
   0x1   :  { %v4_v0 = vld [vmem:[%s376_s0] ss:$0 sm:$0xff]  ;;  %v131_v1 = vld [vmem:[%s376_s0 + $0x1] ss:$0 sm:$0xff]  ;;  %v136_v2 = vld [vmem:[%s376_s0 + $0x2] ss:$0 sm:$0xff] }
   0x2   :  { %5 = vst [vmem:[%s377_s1] sm:$0x3] %v4_v0  ;;  %128 = vst [vmem:[%s377_s1 + $0x18] sm:$0x3] %v4_v0  ;;  %v141_v3 = vld [vmem:[%s376_s0 + $0x3] ss:$0 sm:$0xff] }
   0x3   :  { %129 = vst [vmem:[%s377_s1 + $0x30] sm:$0x3] %v4_v0  ;;  %130 = vst [vmem:[%s377_s1 + $0x48] sm:$0x3] %v4_v0  ;;  %v146_v4 = vld [vmem:[%s376_s0 + $0x4] ss:$0 sm:$0xff] }
   0x4   :  { %132 = vst [vmem:[%s377_s1 + $0x2] sm:$0x3] %v131_v1  ;;  %133 = vst [vmem:[%s377_s1 + $0x1a] sm:$0x3] %v131_v1  ;;  %v151_v5 = vld [vmem:[%s376_s0 + $0x5] ss:$0 sm:$0xff] }
   0x5   :  { %134 = vst [vmem:[%s377_s1 + $0x32] sm:$0x3] %v131_v1  ;;  %135 = vst [vmem:[%s377_s1 + $0x4a] sm:$0x3] %v131_v1  ;;  %v156_v6 = vld [vmem:[%s376_s0 + $0x6] ss:$0 sm:$0xff] }
   0x6   :  { %137 = vst [vmem:[%s377_s1 + $0x4] sm:$0x3] %v136_v2  ;;  %138 = vst [vmem:[%s377_s1 + $0x1c] sm:$0x3] %v136_v2  ;;  %v161_v7 = vld [vmem:[%s376_s0 + $0x7] ss:$0 sm:$0xff] }
   0x7   :  { %139 = vst [vmem:[%s377_s1 + $0x34] sm:$0x3] %v136_v2  ;;  %140 = vst [vmem:[%s377_s1 + $0x4c] sm:$0x3] %v136_v2  ;;  %v166_v8 = vld [vmem:[%s376_s0 + $0x8] ss:$0 sm:$0xff] }
   0x8   :  { %142 = vst [vmem:[%s377_s1 + $0x6] sm:$0x3] %v141_v3  ;;  %143 = vst [vmem:[%s377_s1 + $0x1e] sm:$0x3] %v141_v3  ;;  %v171_v9 = vld [vmem:[%s376_s0 + $0x9] ss:$0 sm:$0xff] }
   0x9   :  { %144 = vst [vmem:[%s377_s1 + $0x36] sm:$0x3] %v141_v3  ;;  %145 = vst [vmem:[%s377_s1 + $0x4e] sm:$0x3] %v141_v3  ;;  %v176_v10 = vld [vmem:[%s376_s0 + $0xa] ss:$0 sm:$0xff] }
   0xa   :  { %147 = vst [vmem:[%s377_s1 + $0x8] sm:$0x3] %v146_v4  ;;  %148 = vst [vmem:[%s377_s1 + $0x20] sm:$0x3] %v146_v4  ;;  %v181_v11 = vld [vmem:[%s376_s0 + $0xb] ss:$0 sm:$0xff] }
   0xb   :  { %149 = vst [vmem:[%s377_s1 + $0x38] sm:$0x3] %v146_v4  ;;  %150 = vst [vmem:[%s377_s1 + $0x50] sm:$0x3] %v146_v4 }
   0xc   :  { %152 = vst [vmem:[%s377_s1 + $0xa] sm:$0x3] %v151_v5  ;;  %153 = vst [vmem:[%s377_s1 + $0x22] sm:$0x3] %v151_v5 }
   0xd   :  { %154 = vst [vmem:[%s377_s1 + $0x3a] sm:$0x3] %v151_v5  ;;  %155 = vst [vmem:[%s377_s1 + $0x52] sm:$0x3] %v151_v5 }
   0xe   :  { %157 = vst [vmem:[%s377_s1 + $0xc] sm:$0x3] %v156_v6  ;;  %158 = vst [vmem:[%s377_s1 + $0x24] sm:$0x3] %v156_v6 }
   0xf   :  { %159 = vst [vmem:[%s377_s1 + $0x3c] sm:$0x3] %v156_v6  ;;  %160 = vst [vmem:[%s377_s1 + $0x54] sm:$0x3] %v156_v6 }
  0x10   :  { %162 = vst [vmem:[%s377_s1 + $0xe] sm:$0x3] %v161_v7  ;;  %163 = vst [vmem:[%s377_s1 + $0x26] sm:$0x3] %v161_v7 }
  0x11   :  { %164 = vst [vmem:[%s377_s1 + $0x3e] sm:$0x3] %v161_v7  ;;  %165 = vst [vmem:[%s377_s1 + $0x56] sm:$0x3] %v161_v7 }
  0x12   :  { %167 = vst [vmem:[%s377_s1 + $0x10] sm:$0x3] %v166_v8  ;;  %168 = vst [vmem:[%s377_s1 + $0x28] sm:$0x3] %v166_v8 }
  0x13   :  { %169 = vst [vmem:[%s377_s1 + $0x40] sm:$0x3] %v166_v8  ;;  %170 = vst [vmem:[%s377_s1 + $0x58] sm:$0x3] %v166_v8 }
  0x14   :  { %172 = vst [vmem:[%s377_s1 + $0x12] sm:$0x3] %v171_v9  ;;  %173 = vst [vmem:[%s377_s1 + $0x2a] sm:$0x3] %v171_v9 }
  0x15   :  { %174 = vst [vmem:[%s377_s1 + $0x42] sm:$0x3] %v171_v9  ;;  %175 = vst [vmem:[%s377_s1 + $0x5a] sm:$0x3] %v171_v9 }
  0x16   :  { %177 = vst [vmem:[%s377_s1 + $0x14] sm:$0x3] %v176_v10  ;;  %178 = vst [vmem:[%s377_s1 + $0x2c] sm:$0x3] %v176_v10 }
  0x17   :  { %179 = vst [vmem:[%s377_s1 + $0x44] sm:$0x3] %v176_v10  ;;  %180 = vst [vmem:[%s377_s1 + $0x5c] sm:$0x3] %v176_v10 }
  0x18   :  { %182 = vst [vmem:[%s377_s1 + $0x16] sm:$0x3] %v181_v11  ;;  %183 = vst [vmem:[%s377_s1 + $0x2e] sm:$0x3] %v181_v11 }
  0x19   :  { %184 = vst [vmem:[%s377_s1 + $0x46] sm:$0x3] %v181_v11  ;;  %185 = vst [vmem:[%s377_s1 + $0x5e] sm:$0x3] %v181_v11 }

// kernel: block_pallas.1
= control target key start
LH: loop header
LB: loop body
LE: loop exit
PB: predicated region body
PF: predicated region fallthrough
CT: control target
= control target key end

     0   :  { %vm20_vm0 = vcmask 392192   ;;  %s3314_s0 = inlined_call_operand.vmem [shape: f32[32,48], index: 0, kind: input, shape index: {}]   ;;  %s3315_s1 = inlined_call_operand.vmem [shape: f32[48,816], index: 1, kind: input, shape index: {}]   ;;  %s3316_s2 = inlined_call_operand.vmem [shape: f32[480,128], index: 2, kind: input, shape index: {}]   ;;  %s3317_s3 = inlined_call_operand.hbm [shape: f32[32,128], index: 3, kind: output, shape index: {}]  }
   0x1   :  { %v2445_v0 = vld [vmem:[%s3314_s0 + $0x8] sm:$0xff]  ;;  %v2450_v1 = vld [vmem:[%s3314_s0] sm:$0xff]  ;;  %v2455_v2 = vld [vmem:[%s3314_s0 + $0x10] sm:$0xff] }
   0x2   :  { %v24_v3 = vsel %vm20_vm0, %v2445_v0, 0.0  ;;  %v21_v4 = vsel %vm20_vm0, %v2450_v1, 0.0  ;;  %v39_v5 = vmul.f32 %v2445_v0, %v2445_v0  ;;  %v38_v6 = vmul.f32 %v2450_v1, %v2450_v1 }
   0x3   :  { %8 = vsyncpa [#allocation3], 0  ;;  %25 = vadd.xlane.f32.xlu1 %v24_v3  ;;  %22 = vadd.xlane.f32.xlu0 %v21_v4  ;;  %v40_v9 = vmul.f32 %v2455_v2, %v2455_v2  ;;  %v2472_v10 = vld [vmem:[%s3314_s0 + $0x18] sm:$0xff]  ;;  %v27_v11 = vsel %vm20_vm0, %v2455_v2, 0.0  ;;  %v91_v16 = vld [vmem:[%s3315_s1 + $0x28] sm:$0xff]  ;;  %v2411_v34 = vmov 0.0  }
   0x4   :  { %v45_v7 = vsel %vm20_vm0, %v39_v5, 0.0  ;;  %v42_v8 = vsel %vm20_vm0, %v38_v6, 0.0  ;;  %v41_v13 = vmul.f32 %v2472_v10, %v2472_v10  ;;  %v30_v14 = vsel %vm20_vm0, %v2472_v10, 0.0  ;;  %v93_v17 = vld [vmem:[%s3315_s1 + $0x60] sm:$0xff]  ;;  %v92_v20 = vld [vmem:[%s3315_s1 + $0x58] sm:$0xff]  ;;  %v97_v23 = vld [vmem:[%s3315_s1 + $0xd0] sm:$0xff]  ;;  %178 = vmatprep.mubr.f32.mxu1 %v2411_v34 }
   0x5   :  { %v48_v12 = vsel %vm20_vm0, %v40_v9, 0.0  ;;  %v1998_v18 = vpack.c.bf16 %v93_v17, %v91_v16  ;;  %v90_v19 = vld [vmem:[%s3315_s1 + $0x20] sm:$0xff]  ;;  %v95_v22 = vld [vmem:[%s3315_s1 + $0x98] sm:$0xff]  ;;  %v94_v25 = vld [vmem:[%s3315_s1 + $0x90] sm:$0xff]  ;;  %s2412_s21 = smov 64   ;;  %s2413_s26 = smov 48  }
   0x6   :  { %v51_v15 = vsel %vm20_vm0, %v41_v13, 0.0  ;;  %v2000_v21 = vpack.c.bf16 %v92_v20, %v90_v19  ;;  %v2002_v24 = vpack.c.bf16 %v97_v23, %v95_v22  ;;  %v96_v26 = vld [vmem:[%s3315_s1 + $0xc8] sm:$0xff]  ;;  %v101_v29 = vld [vmem:[%s3315_s1 + $0x140] sm:$0xff]  ;;  %v100_v32 = vld [vmem:[%s3315_s1 + $0x138] sm:$0xff]  ;;  %s2414_s6 = smov 112   ;;  %s2415_s11 = smov 16  }
   0x7   :  { %46 = vadd.xlane.f32.xlu1 %v45_v7  ;;  %43 = vadd.xlane.f32.xlu0 %v42_v8  ;;  %v2004_v27 = vpack.c.bf16 %v96_v26, %v94_v25  ;;  %v99_v28 = vld [vmem:[%s3315_s1 + $0x108] sm:$0xff]  ;;  %v98_v31 = vld [vmem:[%s3315_s1 + $0x100] sm:$0xff]  ;;  %v2534_v37 = vld [vmem:[%s3316_s2 + $0x1b0] sm:$0xff]  ;;  %s2416_s12 = smov 80   ;;  %s2417_s15 = smov 96   ;;  %vm897_vm2 = vcmask 261120  }
   0x8   :  { %1999 = vmatprep.subr.bf16.mxu1 %v1998_v18  ;;  %v2006_v30 = vpack.c.bf16 %v101_v29, %v99_v28  ;;  %v2008_v33 = vpack.c.bf16 %v100_v32, %v98_v31  ;;  %v2522_v35 = vld [vmem:[%s3316_s2 + $0x1a8] sm:$0xff]  ;;  %v2527_v36 = vld [vmem:[%s3316_s2 + $0x1a0] sm:$0xff]  ;;  %v2547_v39 = vld [vmem:[%s3316_s2 + $0x1b8] sm:$0xff]  ;;  %s2418_s16 = smov 32  }
   0x9   :  { %2001 = vmatpush1.bf16.msra.mxu1 %v2000_v21  ;;  %v2539_v38 = vld [vmem:[%s3316_s2 + $0x180] sm:$0xff]  ;;  %v2553_v40 = vld [vmem:[%s3316_s2 + $0x188] sm:$0xff]  ;;  %v205_v29 = vld [vmem:[%s3316_s2 + $0x190] sm:$0xff] }
   0xa   :  { %2003 = vmatprep.subr.bf16.mxu1 %v2002_v24  ;;  %vm2636_vm1 = vmpackc.low %vm20_vm0, %vm20_vm0 }
   0xb   :  { %28 = vadd.xlane.f32.xlu0 %v27_v11  ;;  %49 = vadd.xlane.f32.xlu1 %v48_v12  ;;  %v1683_v12 = vld [vmem:[%s3316_s2 + $0x1c0] ss:$0 sm:$0xff] }
   0xd   :  { %2005 = vmatpush1.bf16.msra.mxu1 %v2004_v27 }
   0xe   :  { %2007 = vmatprep.subr.bf16.mxu1 %v2006_v30 }
   0xf   :  { %31 = vadd.xlane.f32.xlu0 %v30_v14  ;;  %52 = vadd.xlane.f32.xlu1 %v51_v15 }
  0x11   :  { %2009 = vmatpush1.bf16.msra.mxu1 %v2008_v33 }
  0x20   :  { %289 = vrot.lane.b32.xlu1 %v2522_v35, %s2412_s21 }
  0x24   :  { %291 = vrot.lane.b32.xlu1 %v2534_v37, %s2412_s21 }
  0x25   :  { %287 = vrot.lane.b32.xlu0 %v2527_v36, %s2412_s21 }
  0x28   :  { %293 = vrot.lane.b32.xlu1 %v2547_v39, %s2412_s21 }
  0x29   :  { %271 = vrot.lane.b32.xlu0 %v2539_v38, %s2413_s26 }
  0x2c   :  { %273 = vrot.lane.b32.xlu1 %v2553_v40, %s2413_s26 }
  0x90   :  { %v26_v41 = vpop.xlane.xlu1 %25  ;;  %v23_v42 = vpop.xlane.xlu0 %22 }
  0x91   :  { %v35_v43 = vmul.f32 0.020833334, %v26_v41  ;;  %v34_v44 = vmul.f32 0.020833334, %v23_v42  ;;  %v206_v41 = vld [vmem:[%s3316_s2 + $0x198] sm:$0xff] }
  0x93   :  { %v63_v45 = vmul.f32 %v35_v43, %v35_v43  ;;  %v62_v48 = vmul.f32 %v34_v44, %v34_v44  ;;  %v58_v9 = vsub.f32 %v2450_v1, %v34_v44  ;;  %v59_v13 = vsub.f32 %v2445_v0, %v35_v43 }
  0x94   :  { %v47_v46 = vpop.xlane.xlu1 %46  ;;  %v44_v47 = vpop.xlane.xlu0 %43 }
  0x95   :  { %v55_v49 = vmul.f32 0.020833334, %v47_v46  ;;  %v54_v50 = vmul.f32 0.020833334, %v44_v47 }
  0x97   :  { %v67_v51 = vsub.f32 %v55_v49, %v63_v45  ;;  %v66_v52 = vsub.f32 %v54_v50, %v62_v48 }
  0x98   :  { %v29_v53 = vpop.xlane.xlu0 %28  ;;  %v50_v54 = vpop.xlane.xlu1 %49 }
  0x99   :  { %v71_v55 = vadd.f32 1e-05, %v67_v51  ;;  %v70_v56 = vadd.f32 1e-05, %v66_v52  ;;  %v36_v57 = vmul.f32 0.020833334, %v29_v53 }
  0x9a   :  { %v56_v58 = vmul.f32 0.020833334, %v50_v54 }
  0x9b   :  { %2271 = vrsqrt.f32 %v71_v55  ;;  %v64_v59 = vmul.f32 %v36_v57, %v36_v57  ;;  %v60_v15 = vsub.f32 %v2455_v2, %v36_v57 }
  0x9c   :  { %2273 = vrsqrt.f32 %v70_v56  ;;  %v32_v60 = vpop.xlane.xlu0 %31  ;;  %v53_v61 = vpop.xlane.xlu1 %52 }
  0x9d   :  { %v68_v62 = vsub.f32 %v56_v58, %v64_v59  ;;  %v37_v63 = vmul.f32 0.020833334, %v32_v60  ;;  %v57_v3 = vmul.f32 0.020833334, %v53_v61 }
  0x9f   :  { %v72_v4 = vadd.f32 1e-05, %v68_v62  ;;  %v65_v5 = vmul.f32 %v37_v63, %v37_v63  ;;  %v61_v19 = vsub.f32 %v2472_v10, %v37_v63  ;;  %v348_v63 = vlaneseq }
  0xa0   :  { %v290_v23 = vpop.permute.xlu1 %289  ;;  %v288_v24 = vpop.permute.xlu0 %287 }
  0xa1   :  { %2275 = vrsqrt.f32 %v72_v4  ;;  %v69_v6 = vsub.f32 %v57_v3, %v65_v5 }
  0xa3   :  { %v73_v7 = vadd.f32 1e-05, %v69_v6 }
  0xa4   :  { %v292_v31 = vpop.permute.xlu1 %291  ;;  %v272_v49 = vpop.permute.xlu0 %271 }
  0xa5   :  { %v2272_v8 = vpop.eup %2271  ;;  %2277 = vrsqrt.f32 %v73_v7 }
  0xa6   :  { %v2274_v11 = vpop.eup %2273  ;;  %v79_v17 = vmul.f32 %v2272_v8, %v59_v13  ;;  %v349_v8 = vshrl.u32 %v348_v63, 7 }
  0xa7   :  { %v78_v14 = vmul.f32 %v2274_v11, %v58_v9 }
  0xa8   :  { %v87_v20 = vmul.f32 %v1683_v12, %v79_v17  ;;  %v294_v45 = vpop.permute.xlu1 %293  ;;  %v358_v13 = vsub.s32 1, %v349_v8 }
  0xa9   :  { %v86_v16 = vmul.f32 %v1683_v12, %v78_v14 }
  0xab   :  { %v2276_v18 = vpop.eup %2275  ;;  %1684 = vmatmul.mubr.msk.f32.vlgmr.msra.gmra.mrb[0].mxu1 %vm20_vm0, %v86_v16 }
  0xac   :  { %184 = vmatprep.mubr.f32.mxu1 %v2411_v34  ;;  %v80_v1 = vmul.f32 %v2276_v18, %v60_v15  ;;  %v274_v50 = vpop.permute.xlu1 %273  ;;  %v347_v15 = vld [vmem:[%s3316_s2 + $0x1d8] sm:$0xf]  ;;  %v374_v18 = vsub.s32 3, %v349_v8 }
  0xae   :  { %v88_v22 = vmul.f32 %v1683_v12, %v80_v1 }
  0xaf   :  { %v2278_v21 = vpop.eup %2277  ;;  %1685 = vmatmul.mubr.msk.f32.gmra.mrb[2].mxu1 %vm20_vm0, %v87_v20 }
  0xb0   :  { %190 = vmatprep.mubr.f32.mxu1 %v2411_v34  ;;  %v81_v0 = vmul.f32 %v2278_v21, %v61_v19  ;;  %v2630_v19 = vrot.slane %v347_v15, %v374_v18 }
  0xb2   :  { %v89_v2 = vmul.f32 %v1683_v12, %v81_v0 }
  0xb3   :  { %1686 = vmatmul.mubr.msk.f32.gmra.mrb[4].mxu1 %vm20_vm0, %v88_v22 }
  0xb4   :  { %196 = vmatprep.mubr.f32.mxu1 %v2411_v34 }
  0xb7   :  { %1687 = vmatmul.mubr.msk.f32.gmra.mrb[6].mxu1 %vm20_vm0, %v89_v2  ;;  %v350_v2 = vsub.s32 0, %v349_v8 }
 0x17e   :  { %v2571_v10 = vpop.f32.mrb[0].mxu1 }
 0x17f   :  { %v2573_v25 = vpop.f32.mrb[1].mxu1  ;;  %v283_v52 = vmul.f32 %v272_v49, %v2571_v10 }
 0x180   :  { %v299_v26 = vmul.f32 %v288_v24, %v2573_v25 }
 0x182   :  { %v2576_v27 = vpop.f32.mrb[2].mxu1  ;;  %307 = vrot.lane.b32.xlu0 %v299_v26, %s2414_s6  ;;  %v211_v26 = vmul.f32 %v2539_v38, %v2571_v10  ;;  %v2661_v38 = vclamps-f32 %v2571_v10, 100.0 }
 0x183   :  { %v2579_v28 = vpop.f32.mrb[3].mxu1  ;;  %v284_v54 = vmul.f32 %v274_v50, %v2576_v27 }
 0x184   :  { %v300_v30 = vmul.f32 %v290_v23, %v2579_v28 }
 0x186   :  { %309 = vrot.lane.b32.xlu1 %v300_v30, %s2414_s6  ;;  %v2586_v32 = vpop.f32.mrb[4].mxu1  ;;  %275 = vrot.lane.b32.xlu0 %v205_v29, %s2413_s26  ;;  %v366_v30 = vsub.s32 2, %v349_v8  ;;  %v2728_v8 = vclamps-f32 %v2576_v27, 100.0 }
 0x187   :  { %v2589_v33 = vpop.f32.mrb[5].mxu1  ;;  %v2595_v42 = vmul.f32 %v205_v29, %v2586_v32  ;;  %v2648_v29 = vrot.slane %v347_v15, %v350_v2 }
 0x188   :  { %v301_v43 = vmul.f32 %v292_v31, %v2589_v33  ;;  %v2678_v10 = vclamps-f32 %v2589_v33, 100.0 }
 0x18a   :  { %277 = vrot.lane.b32.xlu1 %v206_v41, %s2413_s26  ;;  %v2599_v44 = vpop.f32.mrb[6].mxu1  ;;  %311 = vrot.lane.b32.xlu0 %v301_v43, %s2414_s6 }
 0x18b   :  { %v2602_v46 = vpop.f32.mrb[7].mxu1  ;;  %v2605_v47 = vmul.f32 %v206_v41, %v2599_v44 }
 0x18c   :  { %v302_v48 = vmul.f32 %v294_v45, %v2602_v46 }
 0x18e   :  { %313 = vrot.lane.b32.xlu1 %v302_v48, %s2414_s6  ;;  %219 = vrot.lane.b32.xlu0 %v2527_v36, %s2415_s11 }
 0x192   :  { %221 = vrot.lane.b32.xlu1 %v2522_v35, %s2415_s11 }
 0x196   :  { %223 = vrot.lane.b32.xlu1 %v2534_v37, %s2415_s11 }
 0x1f4   :  { %v308_v51 = vpop.permute.xlu0 %307 }
 0x1f5   :  { %v319_v53 = vadd.f32 %v308_v51, %v283_v52  ;;  %v2652_v51 = vrot.slane %v347_v15, %v366_v30 }
 0x1f7   :  { %v1692_v58 = vclamps-f32 %v319_v53, 100.0 }
 0x1f8   :  { %v310_v55 = vpop.permute.xlu1 %309  ;;  %v276_v56 = vpop.permute.xlu0 %275 }
 0x1f9   :  { %v320_v57 = vadd.f32 %v310_v55, %v284_v54  ;;  %v285_v35 = vmul.f32 %v276_v56, %v2586_v32  ;;  %v2664_v54 = vclamps-f32 %v2573_v25, 100.0 }
 0x1fb   :  { %v1693_v59 = vclamps-f32 %v320_v57, 100.0  ;;  %v2675_v57 = vclamps-f32 %v2586_v32, 100.0 }
 0x1fc   :  { %v278_v60 = vpop.permute.xlu1 %277  ;;  %v312_v61 = vpop.permute.xlu0 %311 }
 0x1fd   :  { %v2181_v36 = vpack.i.bf16 %v1693_v59, %v1692_v58  ;;  %v286_v37 = vmul.f32 %v278_v60, %v2599_v44  ;;  %v321_v62 = vadd.f32 %v312_v61, %v285_v35 }
 0x1ff   :  { %2182 = vrot.lane.b32.xlu0 %v2181_v36, %s2416_s12  ;;  %v1694_v6 = vclamps-f32 %v321_v62, 100.0  ;;  %v212_v36 = vmul.f32 %v2553_v40, %v2576_v27 }
 0x200   :  { %v314_v3 = vpop.permute.xlu1 %313  ;;  %v220_v5 = vpop.permute.xlu0 %219 }
 0x201   :  { %v322_v4 = vadd.f32 %v314_v3, %v286_v37  ;;  %v231_v12 = vmul.f32 %v220_v5, %v2573_v25 }
 0x203   :  { %v1695_v7 = vclamps-f32 %v322_v4, 100.0  ;;  %225 = vrot.lane.b32.xlu0 %v2547_v39, %s2415_s11  ;;  %v2626_v39 = vrot.slane %v347_v15, %v358_v13 }
 0x204   :  { %v222_v9 = vpop.permute.xlu1 %221 }
 0x205   :  { %v2186_v11 = vpack.i.bf16 %v1695_v7, %v1694_v6  ;;  %v232_v16 = vmul.f32 %v222_v9, %v2579_v28 }
 0x207   :  { %2187 = vrot.lane.b32.xlu1 %v2186_v11, %s2416_s12  ;;  %239 = vrot.lane.b32.xlu0 %v231_v12, %s2414_s6  ;;  %v2731_v11 = vclamps-f32 %v2579_v28, 100.0 }
 0x208   :  { %v224_v14 = vpop.permute.xlu1 %223 }
 0x209   :  { %v233_v17 = vmul.f32 %v224_v14, %v2589_v33 }
 0x20b   :  { %241 = vrot.lane.b32.xlu1 %v232_v16, %s2414_s6  ;;  %243 = vrot.lane.b32.xlu0 %v233_v17, %s2414_s6 }
 0x20f   :  { %766 = vrot.lane.b32.xlu0 %v2626_v39, %s2417_s15 }
 0x213   :  { %790 = vrot.lane.b32.xlu0 %v2630_v19, %s2417_s15 }
 0x271   :  { %v2183_v1 = vpop.permute.xlu0 %2182 }
 0x272   :  { %v2185_v20 = vunpack.i.h.bf16 %v2183_v1  ;;  %v2184_v21 = vunpack.i.l.bf16 %v2183_v1 }
 0x274   :  { %v2010_v0 = vpack.c.bf16 %v2185_v20, %v2184_v21 }
 0x275   :  { %v226_v23 = vpop.permute.xlu0 %225 }
 0x276   :  { %v234_v24 = vmul.f32 %v226_v23, %v2602_v46  ;;  %2012 = vmatprep.subr.msk.bf16.mxu1 %vm2636_vm1, %v2010_v0  ;;  %v2754_v23 = vclamps-f32 %v2599_v44, 100.0 }
 0x277   :  { %2015 = vmatpush3.bf16.xpose.msk.msra.mxu1 %vm2636_vm1, %v2010_v0 }
 0x278   :  { %245 = vrot.lane.b32.xlu1 %v234_v24, %s2414_s6  ;;  %v2757_v24 = vclamps-f32 %v2602_v46, 100.0 }
 0x279   :  { %v2188_v31 = vpop.permute.xlu1 %2187  ;;  %v240_v41 = vpop.permute.xlu0 %239 }
 0x27a   :  { %v2190_v43 = vunpack.i.h.bf16 %v2188_v31  ;;  %v2189_v45 = vunpack.i.l.bf16 %v2188_v31  ;;  %v251_v48 = vadd.f32 %v240_v41, %v211_v26 }
 0x27c   :  { %v2016_v49 = vpack.c.bf16 %v2190_v43, %v2189_v45  ;;  %v1688_v50 = vclamps-f32 %v251_v48, 100.0  ;;  %754 = vrot.lane.b32.xlu1 %v2648_v29, %s2417_s15 }
 0x27d   :  { %v244_v52 = vpop.permute.xlu0 %243  ;;  %v242_v33 = vpop.permute.xlu1 %241 }
 0x27e   :  { %v2654_v53 = vmul.f32 0.28867513, %v1688_v50  ;;  %2018 = vmatprep.subr.msk.bf16.mxu1 %vm2636_vm1, %v2016_v49  ;;  %v252_v35 = vadd.f32 %v242_v33, %v212_v36  ;;  %v253_v37 = vadd.f32 %v244_v52, %v2595_v42 }
 0x27f   :  { %2021 = vmatpush3.bf16.xpose.msk.msra.mxu1 %vm2636_vm1, %v2016_v49 }
 0x280   :  { %778 = vrot.lane.b32.xlu1 %v2652_v51, %s2417_s15  ;;  %2024 = vmatprep.subr.msk.bf16.mxu1 %vm2636_vm1, %v2010_v0  ;;  %v352_v55 = vmul.f32 %v2648_v29, %v2654_v53  ;;  %v1689_v62 = vclamps-f32 %v252_v35, 100.0  ;;  %v1690_v63 = vclamps-f32 %v253_v37, 100.0  ;;  %v360_v27 = vmul.f32 %v2626_v39, %v2654_v53 }
 0x281   :  { %v2672_v56 = vpop.permute.xlu0 %766  ;;  %v368_v46 = vmul.f32 %v2652_v51, %v2654_v53 }
 0x282   :  { %1900 = vmatprep.mubr.msk.f32.mxu1 %vm20_vm0, %v352_v55  ;;  %v769_v25 = vmul.f32 %v2661_v38, %v2672_v56  ;;  %v770_v58 = vmul.f32 %v2664_v54, %v2672_v56  ;;  %v773_v60 = vmul.f32 %v2675_v57, %v2672_v56  ;;  %v774_v61 = vmul.f32 %v2678_v10, %v2672_v56 }
 0x283   :  { %v2716_v3 = vmul.f32 0.28867513, %v1689_v62  ;;  %v2718_v4 = vmul.f32 0.28867513, %v1690_v63  ;;  %v771_v43 = vmul.f32 %v2728_v8, %v2672_v56  ;;  %v772_v45 = vmul.f32 %v2731_v11, %v2672_v56 }
 0x284   :  { %v2211_v59 = vpack.i.bf16 %v770_v58, %v769_v25  ;;  %v2221_v32 = vpack.i.bf16 %v774_v61, %v773_v60  ;;  %v775_v50 = vmul.f32 %v2754_v23, %v2672_v56  ;;  %v776_v52 = vmul.f32 %v2757_v24, %v2672_v56 }
 0x285   :  { %v353_v40 = vmul.f32 %v2648_v29, %v2716_v3  ;;  %v354_v5 = vmul.f32 %v2648_v29, %v2718_v4  ;;  %v361_v2 = vmul.f32 %v2626_v39, %v2716_v3  ;;  %v362_v26 = vmul.f32 %v2626_v39, %v2718_v4  ;;  %v2809_v63 = vpop.permute.xlu0 %790 }
 0x286   :  { %2212 = vrot.lane.b32.xlu0 %v2211_v59, %s2418_s16  ;;  %v369_v48 = vmul.f32 %v2652_v51, %v2716_v3  ;;  %v376_v25 = vmul.f32 %v2630_v19, %v2654_v53  ;;  %v2226_v58 = vpack.i.bf16 %v776_v52, %v775_v50  ;;  %v377_v56 = vmul.f32 %v2630_v19, %v2716_v3 }
 0x287   :  { %2027 = vmatpush3.bf16.xpose.msk.msra.mxu1 %vm2636_vm1, %v2010_v0 }
 0x288   :  { %2030 = vmatprep.subr.msk.bf16.mxu1 %vm2636_vm1, %v2016_v49 }
 0x28a   :  { %2222 = vrot.lane.b32.xlu0 %v2221_v32, %s2418_s16 }
 0x28f   :  { %2033 = vmatpush3.bf16.xpose.msk.msra.mxu1 %vm2636_vm1, %v2016_v49 }
 0x290   :  { %2036 = vmatprep.subr.msk.bf16.mxu1 %vm2636_vm1, %v2010_v0 }
 0x297   :  { %2039 = vmatpush3.bf16.xpose.msk.msra.mxu1 %vm2636_vm1, %v2010_v0 }
 0x298   :  { %2042 = vmatprep.subr.msk.bf16.mxu1 %vm2636_vm1, %v2016_v49 }
 0x29f   :  { %2045 = vmatpush3.bf16.xpose.msk.msra.mxu1 %vm2636_vm1, %v2016_v49 }
 0x2a0   :  { %2048 = vmatprep.subr.msk.bf16.mxu1 %vm2636_vm1, %v2010_v0 }
 0x2a7   :  { %2051 = vmatpush3.bf16.xpose.msk.msra.mxu1 %vm2636_vm1, %v2010_v0 }
 0x2a8   :  { %2054 = vmatprep.subr.msk.bf16.mxu1 %vm2636_vm1, %v2016_v49 }
 0x2af   :  { %2057 = vmatpush3.bf16.xpose.msk.msra.mxu1 %vm2636_vm1, %v2016_v49  ;;  %v2216_v49 = vpack.i.bf16 %v772_v45, %v771_v43 }
 0x2b6   :  { %1901 = vmatmul.mubr.msk.f32.vlgmr.msra.gmra.mrb[8].mxu1 %vm20_vm0, %v353_v40 }
 0x2b7   :  { %1903 = vmatprep.mubr.msk.f32.mxu1 %vm20_vm0, %v354_v5 }
 0x2ea   :  { %v246_v42 = vpop.permute.xlu1 %245 }
 0x2eb   :  { %v254_v6 = vadd.f32 %v246_v42, %v2605_v47 }
 0x2ed   :  { %v1691_v7 = vclamps-f32 %v254_v6, 100.0 }
 0x2ee   :  { %v755_v9 = vpop.permute.xlu1 %754 }
 0x2ef   :  { %v266_v12 = vmul.f32 0.28867513, %v1691_v7  ;;  %v757_v13 = vmul.f32 %v2661_v38, %v755_v9  ;;  %v758_v14 = vmul.f32 %v2664_v54, %v755_v9  ;;  %v759_v17 = vmul.f32 %v2728_v8, %v755_v9 }
 0x2f0   :  { %v760_v47 = vmul.f32 %v2731_v11, %v755_v9  ;;  %v761_v22 = vmul.f32 %v2675_v57, %v755_v9  ;;  %v762_v0 = vmul.f32 %v2678_v10, %v755_v9  ;;  %v763_v30 = vmul.f32 %v2754_v23, %v755_v9 }
 0x2f1   :  { %v2191_v15 = vpack.i.bf16 %v758_v14, %v757_v13  ;;  %v355_v16 = vmul.f32 %v2648_v29, %v266_v12  ;;  %v764_v44 = vmul.f32 %v2757_v24, %v755_v9  ;;  %v363_v31 = vmul.f32 %v2626_v39, %v266_v12 }
 0x2f2   :  { %v2738_v18 = vpop.permute.xlu1 %778  ;;  %v2196_v20 = vpack.i.bf16 %v760_v47, %v759_v17  ;;  %v2201_v29 = vpack.i.bf16 %v762_v0, %v761_v22  ;;  %v370_v39 = vmul.f32 %v2652_v51, %v2718_v4  ;;  %v371_v55 = vmul.f32 %v2652_v51, %v266_v12 }
 0x2f3   :  { %2192 = vrot.lane.b32.xlu1 %v2191_v15, %s2418_s16  ;;  %1904 = vmatmul.mubr.msk.f32.gmra.mrb[10].mxu1 %vm20_vm0, %v355_v16  ;;  %v781_v28 = vmul.f32 %v2661_v38, %v2738_v18  ;;  %v782_v1 = vmul.f32 %v2664_v54, %v2738_v18  ;;  %v2206_v41 = vpack.i.bf16 %v764_v44, %v763_v30 }
 0x2f4   :  { %1906 = vmatprep.mubr.msk.f32.mxu1 %vm20_vm0, %v360_v27  ;;  %v783_v59 = vmul.f32 %v2728_v8, %v2738_v18  ;;  %v784_v60 = vmul.f32 %v2731_v11, %v2738_v18  ;;  %v378_v51 = vmul.f32 %v2630_v19, %v2718_v4  ;;  %v379_v61 = vmul.f32 %v2630_v19, %v266_v12 }
 0x2f5   :  { %v2231_v21 = vpack.i.bf16 %v782_v1, %v781_v28 }
 0x2f6   :  { %v2236_v53 = vpack.i.bf16 %v784_v60, %v783_v59 }
 0x2f7   :  { %2197 = vrot.lane.b32.xlu1 %v2196_v20, %s2418_s16  ;;  %2232 = vrot.lane.b32.xlu0 %v2231_v21, %s2418_s16 }
 0x2f8   :  { %1907 = vmatmul.mubr.msk.f32.gmra.mrb[12].mxu1 %vm20_vm0, %v361_v2  ;;  %v2213_v5 = vpop.permute.xlu0 %2212 }
 0x2f9   :  { %1909 = vmatprep.mubr.msk.f32.mxu1 %vm20_vm0, %v362_v26  ;;  %v2215_v13 = vunpack.i.h.bf16 %v2213_v5  ;;  %v2214_v14 = vunpack.i.l.bf16 %v2213_v5 }
 0x2fb   :  { %2202 = vrot.lane.b32.xlu1 %v2201_v29, %s2418_s16  ;;  %v902_v22 = vsel %vm897_vm2, %v2214_v14, %v2215_v13 }
 0x2fc   :  { %1910 = vmatmul.mubr.msk.f32.gmra.mrb[14].mxu1 %vm20_vm0, %v363_v31  ;;  %v2223_v17 = vpop.permute.xlu0 %2222 }
 0x2fd   :  { %1912 = vmatprep.mubr.msk.f32.mxu1 %vm20_vm0, %v368_v46  ;;  %v2225_v20 = vunpack.i.h.bf16 %v2223_v17  ;;  %v2224_v21 = vunpack.i.l.bf16 %v2223_v17  ;;  %v388_v17 = vld [vmem:[%s3316_s2 + $0x40] sm:$0xff] }
 0x2ff   :  { %2207 = vrot.lane.b32.xlu1 %v2206_v41, %s2418_s16  ;;  %v904_v41 = vsel %vm897_vm2, %v2224_v21, %v2225_v20 }
 0x300   :  { %1913 = vmatmul.mubr.msk.f32.gmra.mrb[16].mxu1 %vm20_vm0, %v369_v48 }
 0x301   :  { %1915 = vmatprep.mubr.msk.f32.mxu1 %vm20_vm0, %v370_v39 }
 0x303   :  { %2217 = vrot.lane.b32.xlu1 %v2216_v49, %s2418_s16 }
 0x304   :  { %1916 = vmatmul.mubr.msk.f32.gmra.mrb[18].mxu1 %vm20_vm0, %v371_v55 }
 0x305   :  { %1918 = vmatprep.mubr.msk.f32.mxu1 %vm20_vm0, %v376_v25  ;;  %v381_v25 = vld [vmem:[%s3316_s2 + $0x8] sm:$0xff] }
 0x307   :  { %2227 = vrot.lane.b32.xlu1 %v2226_v58, %s2418_s16  ;;  %v380_v58 = vld [vmem:[%s3316_s2] sm:$0xff] }
 0x308   :  { %1919 = vmatmul.mubr.msk.f32.gmra.mrb[20].mxu1 %vm20_vm0, %v377_v56 }
 0x309   :  { %1921 = vmatprep.mubr.msk.f32.mxu1 %vm20_vm0, %v378_v51 }
 0x30b   :  { %2237 = vrot.lane.b32.xlu1 %v2236_v53, %s2418_s16  ;;  %v383_v53 = vld [vmem:[%s3316_s2 + $0x18] sm:$0xff] }
 0x30c   :  { %1922 = vmatmul.mubr.msk.f32.gmra.mrb[22].mxu1 %vm20_vm0, %v379_v61 }
 0x30d   :  { %1457 = vmatprep.mubr.f32.mxu1 %v2411_v34 }
 0x365   :  { %v2193_v32 = vpop.permute.xlu1 %2192 }
 0x366   :  { %v2195_v33 = vunpack.i.h.bf16 %v2193_v32  ;;  %v2194_v36 = vunpack.i.l.bf16 %v2193_v32 }
 0x368   :  { %v898_v3 = vsel %vm897_vm2, %v2194_v36, %v2195_v33  ;;  %v382_v36 = vld [vmem:[%s3316_s2 + $0x10] sm:$0xff] }
 0x369   :  { %v2198_v35 = vpop.permute.xlu1 %2197  ;;  %v2233_v2 = vpop.permute.xlu0 %2232 }
 0x36a   :  { %v2200_v37 = vunpack.i.h.bf16 %v2198_v35  ;;  %v2199_v62 = vunpack.i.l.bf16 %v2198_v35  ;;  %v2235_v31 = vunpack.i.h.bf16 %v2233_v2  ;;  %v2234_v46 = vunpack.i.l.bf16 %v2233_v2  ;;  %v385_v35 = vld [vmem:[%s3316_s2 + $0x28] sm:$0xff] }
 0x36c   :  { %v899_v4 = vsel %vm897_vm2, %v2199_v62, %v2200_v37  ;;  %v906_v50 = vsel %vm897_vm2, %v2234_v46, %v2235_v31  ;;  %v788_v31 = vmul.f32 %v2757_v24, %v2738_v18 }
 0x36d   :  { %v2203_v19 = vpop.permute.xlu1 %2202  ;;  %v2058_v40 = vpack.c.bf16 %v899_v4, %v898_v3 }
 0x36e   :  { %v2205_v42 = vunpack.i.h.bf16 %v2203_v19  ;;  %v2204_v6 = vunpack.i.l.bf16 %v2203_v19  ;;  %v384_v19 = vld [vmem:[%s3316_s2 + $0x20] sm:$0xff] }
 0x36f   :  { %2059 = vmatprep.subr.bf16.mxu0 %v2058_v40 }
 0x370   :  { %2061 = vmatpush3.bf16.msra.mxu0 %v2058_v40  ;;  %v900_v15 = vsel %vm897_vm2, %v2204_v6, %v2205_v42  ;;  %v387_v40 = vld [vmem:[%s3316_s2 + $0x38] sm:$0xff] }
 0x371   :  { %v2208_v7 = vpop.permute.xlu1 %2207 }
 0x372   :  { %v2210_v9 = vunpack.i.h.bf16 %v2208_v7  ;;  %v2209_v12 = vunpack.i.l.bf16 %v2208_v7 }
 0x374   :  { %v901_v16 = vsel %vm897_vm2, %v2209_v12, %v2210_v9  ;;  %v386_v9 = vld [vmem:[%s3316_s2 + $0x30] sm:$0xff]  ;;  %v389_v12 = vld [vmem:[%s3316_s2 + $0x48] sm:$0xff] }
 0x375   :  { %v2218_v47 = vpop.permute.xlu1 %2217  ;;  %v2062_v27 = vpack.c.bf16 %v901_v16, %v900_v15 }
 0x376   :  { %v2220_v28 = vunpack.i.h.bf16 %v2218_v47  ;;  %v2219_v1 = vunpack.i.l.bf16 %v2218_v47 }
 0x377   :  { %2063 = vmatprep.subr.bf16.mxu0 %v2062_v27 }
 0x378   :  { %2065 = vmatpush3.bf16.msra.mxu0 %v2062_v27  ;;  %v903_v0 = vsel %vm897_vm2, %v2219_v1, %v2220_v28  ;;  %v391_v28 = vld [vmem:[%s3316_s2 + $0x58] sm:$0xff] }
 0x379   :  { %v2228_v26 = vpop.permute.xlu1 %2227  ;;  %v2066_v29 = vpack.c.bf16 %v903_v0, %v902_v22  ;;  %v390_v22 = vld [vmem:[%s3316_s2 + $0x50] sm:$0xff] }
 0x37a   :  { %v2230_v30 = vunpack.i.h.bf16 %v2228_v26  ;;  %v2229_v44 = vunpack.i.l.bf16 %v2228_v26 }
 0x37b   :  { %2067 = vmatprep.subr.bf16.mxu0 %v2066_v29 }
 0x37c   :  { %2069 = vmatpush3.bf16.msra.mxu0 %v2066_v29  ;;  %v905_v43 = vsel %vm897_vm2, %v2229_v44, %v2230_v30  ;;  %v393_v29 = vld [vmem:[%s3316_s2 + $0x68] sm:$0xff]  ;;  %v787_v44 = vmul.f32 %v2754_v23, %v2738_v18 }
 0x37d   :  { %v2238_v45 = vpop.permute.xlu1 %2237  ;;  %v2070_v48 = vpack.c.bf16 %v905_v43, %v904_v41  ;;  %v392_v41 = vld [vmem:[%s3316_s2 + $0x60] sm:$0xff] }
 0x37e   :  { %v2240_v39 = vunpack.i.h.bf16 %v2238_v45  ;;  %v2239_v49 = vunpack.i.l.bf16 %v2238_v45  ;;  %v2246_v43 = vpack.i.bf16 %v788_v31, %v787_v44 }
 0x37f   :  { %2071 = vmatprep.subr.bf16.mxu0 %v2070_v48 }
 0x380   :  { %2073 = vmatpush3.bf16.msra.mxu0 %v2070_v48  ;;  %v907_v52 = vsel %vm897_vm2, %v2239_v49, %v2240_v39  ;;  %v785_v48 = vmul.f32 %v2675_v57, %v2738_v18  ;;  %v786_v39 = vmul.f32 %v2678_v10, %v2738_v18  ;;  %v395_v18 = vld [vmem:[%s3316_s2 + $0x78] sm:$0xff] }
 0x381   :  { %v2074_v55 = vpack.c.bf16 %v907_v52, %v906_v50  ;;  %v394_v50 = vld [vmem:[%s3316_s2 + $0x70] sm:$0xff] }
 0x382   :  { %v2241_v49 = vpack.i.bf16 %v786_v39, %v785_v48 }
 0x383   :  { %2075 = vmatprep.subr.bf16.mxu0 %v2074_v55 }
 0x384   :  { %2077 = vmatpush3.bf16.msra.mxu0 %v2074_v55  ;;  %v795_v55 = vmul.f32 %v2728_v8, %v2809_v63 }
 0x389   :  { %v1902_v59 = vpop.f32.mrb[8].mxu1 }
 0x38a   :  { %v2827_v60 = vadd.f32 %v1902_v59, %v381_v25  ;;  %v530_v56 = vpop.f32.mrb[9].mxu1  ;;  %v796_v25 = vmul.f32 %v2731_v11, %v2809_v63  ;;  %v799_v59 = vmul.f32 %v2754_v23, %v2809_v63 }
 0x38b   :  { %v2829_v51 = vadd.f32 %v530_v56, %v380_v58  ;;  %v800_v56 = vmul.f32 %v2757_v24, %v2809_v63  ;;  %v797_v24 = vmul.f32 %v2675_v57, %v2809_v63 }
 0x38c   :  { %611 = vmax.xlane.f32.xlu1 %v2827_v60  ;;  %v2256_v58 = vpack.i.bf16 %v796_v25, %v795_v55 }
 0x38d   :  { %609 = vmax.xlane.f32.xlu0 %v2829_v51  ;;  %v2266_v8 = vpack.i.bf16 %v800_v56, %v799_v59 }
 0x3c6   :  { %v1905_v61 = vpop.f32.mrb[10].mxu1 }
 0x3c7   :  { %v2836_v32 = vadd.f32 %v1905_v61, %v383_v53  ;;  %v540_v33 = vpop.f32.mrb[11].mxu1  ;;  %v793_v61 = vmul.f32 %v2661_v38, %v2809_v63 }
 0x3c8   :  { %v2845_v37 = vadd.f32 %v540_v33, %v382_v36  ;;  %v794_v33 = vmul.f32 %v2664_v54, %v2809_v63 }
 0x3c9   :  { %615 = vmax.xlane.f32.xlu0 %v2836_v32 }
 0x3ca   :  { %v2251_v36 = vpack.i.bf16 %v794_v33, %v793_v61 }
 0x3cb   :  { %v1908_v62 = vpop.f32.mrb[12].mxu1 }
 0x3cc   :  { %v2847_v3 = vadd.f32 %v1908_v62, %v385_v35  ;;  %v550_v4 = vpop.f32.mrb[13].mxu1  ;;  %v798_v35 = vmul.f32 %v2678_v10, %v2809_v63 }
 0x3cd   :  { %613 = vmax.xlane.f32.xlu0 %v2845_v37  ;;  %v2857_v5 = vadd.f32 %v550_v4, %v384_v19 }
 0x3ce   :  { %619 = vmax.xlane.f32.xlu1 %v2847_v3  ;;  %v2261_v4 = vpack.i.bf16 %v798_v35, %v797_v24 }
 0x3cf   :  { %v1911_v42 = vpop.f32.mrb[14].mxu1 }
 0x3d0   :  { %v2859_v6 = vadd.f32 %v1911_v42, %v387_v40  ;;  %v560_v7 = vpop.f32.mrb[15].mxu1 }
 0x3d1   :  { %617 = vmax.xlane.f32.xlu0 %v2857_v5  ;;  %v2869_v13 = vadd.f32 %v560_v7, %v386_v9 }
 0x3d2   :  { %623 = vmax.xlane.f32.xlu1 %v2859_v6 }
 0x3d3   :  { %v1914_v14 = vpop.f32.mrb[16].mxu1 }
 0x3d4   :  { %v2871_v15 = vadd.f32 %v1914_v14, %v389_v12  ;;  %v570_v16 = vpop.f32.mrb[17].mxu1 }
 0x3d5   :  { %621 = vmax.xlane.f32.xlu0 %v2869_v13  ;;  %v2878_v47 = vadd.f32 %v570_v16, %v388_v17 }
 0x3d6   :  { %627 = vmax.xlane.f32.xlu1 %v2871_v15 }
 0x3d7   :  { %v1917_v27 = vpop.f32.mrb[18].mxu1 }
 0x3d8   :  { %v580_v1 = vpop.f32.mrb[19].mxu1  ;;  %v2884_v20 = vadd.f32 %v1917_v27, %v391_v28 }
 0x3d9   :  { %625 = vmax.xlane.f32.xlu0 %v2878_v47  ;;  %v2890_v2 = vadd.f32 %v580_v1, %v390_v22 }
 0x3db   :  { %v1920_v21 = vpop.f32.mrb[20].mxu1 }
 0x3dc   :  { %v590_v0 = vpop.f32.mrb[21].mxu1  ;;  %v2900_v46 = vadd.f32 %v1920_v21, %v393_v29 }
 0x3dd   :  { %631 = vmax.xlane.f32.xlu0 %v2884_v20  ;;  %v2906_v45 = vadd.f32 %v590_v0, %v392_v41 }
 0x3df   :  { %v1923_v26 = vpop.f32.mrb[22].mxu1 }
 0x3e0   :  { %v600_v30 = vpop.f32.mrb[23].mxu1  ;;  %v2932_v53 = vadd.f32 %v1923_v26, %v395_v18 }
 0x3e1   :  { %629 = vmax.xlane.f32.xlu0 %v2890_v2  ;;  %v2918_v52 = vadd.f32 %v600_v30, %v394_v50 }
 0x3e5   :  { %635 = vmax.xlane.f32.xlu0 %v2900_v46 }
 0x3e7   :  { %2247 = vrot.lane.b32.xlu1 %v2246_v43, %s2418_s16 }
 0x3e9   :  { %633 = vmax.xlane.f32.xlu0 %v2906_v45 }
 0x3ff   :  { %2242 = vrot.lane.b32.xlu0 %v2241_v49, %s2418_s16 }
 0x40b   :  { %637 = vmax.xlane.f32.xlu1 %v2918_v52 }
 0x419   :  { %v612_v38 = vpop.xlane.xlu1 %611 }
 0x41a   :  { %v610_v11 = vpop.xlane.xlu0 %609  ;;  %v642_v54 = vsub.f32 %v2827_v60, %v612_v38 }
 0x41b   :  { %v641_v23 = vsub.f32 %v2829_v51, %v610_v11 }
 0x41c   :  { %2257 = vrot.lane.b32.xlu1 %v2256_v58, %s2418_s16  ;;  %v659_v51 = vmul.f32 1.442695, %v642_v54 }
 0x41d   :  { %v657_v62 = vmul.f32 1.442695, %v641_v23 }
 0x41e   :  { %639 = vmax.xlane.f32.xlu0 %v2932_v53 }
 0x41f   :  { %2279 = vpow2.f32 %v657_v62 }
 0x420   :  { %2267 = vrot.lane.b32.xlu1 %v2266_v8, %s2418_s16  ;;  %2281 = vpow2.f32 %v659_v51 }
 0x429   :  { %v2948_v19 = vpop.eup %2279 }
 0x42a   :  { %v2952_v57 = vpop.eup %2281 }
 0x434   :  { %2252 = vrot.lane.b32.xlu0 %v2251_v36, %s2418_s16 }
 0x438   :  { %2262 = vrot.lane.b32.xlu0 %v2261_v4, %s2418_s16 }
 0x444   :  { %689 = vadd.xlane.f32.xlu1 %v2948_v19 }
 0x456   :  { %v616_v40 = vpop.xlane.xlu0 %615 }
 0x457   :  { %v644_v10 = vsub.f32 %v2836_v32, %v616_v40  ;;  %691 = vadd.xlane.f32.xlu0 %v2952_v57 }
 0x459   :  { %v663_v63 = vmul.f32 1.442695, %v644_v10 }
 0x45a   :  { %v614_v42 = vpop.xlane.xlu0 %613 }
 0x45b   :  { %2283 = vpow2.f32 %v663_v63  ;;  %v620_v7 = vpop.xlane.xlu1 %619  ;;  %v643_v9 = vsub.f32 %v2845_v37, %v614_v42 }
 0x45c   :  { %v646_v12 = vsub.f32 %v2847_v3, %v620_v7 }
 0x45d   :  { %v661_v60 = vmul.f32 1.442695, %v643_v9 }
 0x45e   :  { %v667_v14 = vmul.f32 1.442695, %v646_v12  ;;  %v618_v16 = vpop.xlane.xlu0 %617 }
 0x45f   :  { %2285 = vpow2.f32 %v661_v60  ;;  %v624_v17 = vpop.xlane.xlu1 %623  ;;  %v645_v27 = vsub.f32 %v2857_v5, %v618_v16 }
 0x460   :  { %2287 = vpow2.f32 %v667_v14  ;;  %v648_v32 = vsub.f32 %v2859_v6, %v624_v17 }
 0x461   :  { %v665_v28 = vmul.f32 1.442695, %v645_v27 }
 0x462   :  { %v671_v1 = vmul.f32 1.442695, %v648_v32  ;;  %v622_v21 = vpop.xlane.xlu0 %621 }
 0x463   :  { %2289 = vpow2.f32 %v665_v28  ;;  %v628_v22 = vpop.xlane.xlu1 %627  ;;  %v647_v0 = vsub.f32 %v2869_v13, %v622_v21 }
 0x464   :  { %2291 = vpow2.f32 %v671_v1  ;;  %v650_v37 = vsub.f32 %v2871_v15, %v628_v22 }
 0x465   :  { %v2962_v3 = vpop.eup %2283  ;;  %v669_v26 = vmul.f32 1.442695, %v647_v0 }
 0x466   :  { %v675_v29 = vmul.f32 1.442695, %v650_v37  ;;  %695 = vadd.xlane.f32.xlu0 %v2962_v3  ;;  %v626_v5 = vpop.xlane.xlu0 %625 }
 0x467   :  { %2293 = vpow2.f32 %v669_v26  ;;  %v649_v6 = vsub.f32 %v2878_v47, %v626_v5  ;;  %v2248_v59 = vpop.permute.xlu1 %2247 }
 0x468   :  { %2295 = vpow2.f32 %v675_v29  ;;  %v2250_v11 = vunpack.i.h.bf16 %v2248_v59  ;;  %v2249_v61 = vunpack.i.l.bf16 %v2248_v59 }
 0x469   :  { %v2966_v30 = vpop.eup %2285  ;;  %v673_v44 = vmul.f32 1.442695, %v649_v6 }
 0x46a   :  { %v2968_v31 = vpop.eup %2287  ;;  %693 = vadd.xlane.f32.xlu1 %v2966_v30  ;;  %v632_v13 = vpop.xlane.xlu0 %631  ;;  %v909_v62 = vsel %vm897_vm2, %v2249_v61, %v2250_v11 }
 0x46b   :  { %2297 = vpow2.f32 %v673_v44  ;;  %699 = vadd.xlane.f32.xlu0 %v2968_v31  ;;  %v652_v15 = vsub.f32 %v2884_v20, %v632_v13  ;;  %v1088_v44 = vld [vmem:[%s3315_s1 + $0x30] sm:$0xff]  ;;  %v1089_v13 = vld [vmem:[%s3315_s1 + $0x68] sm:$0xff] }
 0x46d   :  { %v2973_v41 = vpop.eup %2289  ;;  %v679_v43 = vmul.f32 1.442695, %v652_v15  ;;  %v2090_v15 = vpack.c.bf16 %v1089_v13, %v1088_v44 }
 0x46e   :  { %v2975_v48 = vpop.eup %2291  ;;  %697 = vadd.xlane.f32.xlu1 %v2973_v41  ;;  %v630_v47 = vpop.xlane.xlu0 %629 }
 0x46f   :  { %2299 = vpow2.f32 %v679_v43  ;;  %703 = vadd.xlane.f32.xlu0 %v2975_v48  ;;  %v651_v39 = vsub.f32 %v2890_v2, %v630_v47 }
 0x471   :  { %v2980_v49 = vpop.eup %2293  ;;  %v677_v50 = vmul.f32 1.442695, %v651_v39 }
 0x472   :  { %v2982_v55 = vpop.eup %2295  ;;  %701 = vadd.xlane.f32.xlu1 %v2980_v49  ;;  %v636_v20 = vpop.xlane.xlu0 %635 }
 0x473   :  { %2301 = vpow2.f32 %v677_v50  ;;  %707 = vadd.xlane.f32.xlu0 %v2982_v55  ;;  %v654_v25 = vsub.f32 %v2900_v46, %v636_v20  ;;  %v1090_v50 = vld [vmem:[%s3315_s1 + $0xa0] sm:$0xff]  ;;  %v1091_v20 = vld [vmem:[%s3315_s1 + $0xd8] sm:$0xff] }
 0x474   :  { %v2094_v59 = vpack.c.bf16 %v1091_v20, %v1090_v50 }
 0x475   :  { %v2987_v18 = vpop.eup %2297  ;;  %v683_v58 = vmul.f32 1.442695, %v654_v25 }
 0x476   :  { %705 = vadd.xlane.f32.xlu1 %v2987_v18  ;;  %v634_v2 = vpop.xlane.xlu0 %633 }
 0x477   :  { %2303 = vpow2.f32 %v683_v58  ;;  %v653_v56 = vsub.f32 %v2906_v45, %v634_v2  ;;  %v1092_v2 = vld [vmem:[%s3315_s1 + $0x110] sm:$0xff] }
 0x479   :  { %v2991_v8 = vpop.eup %2299  ;;  %v681_v33 = vmul.f32 1.442695, %v653_v56 }
 0x47a   :  { %711 = vadd.xlane.f32.xlu0 %v2991_v8  ;;  %v2243_v23 = vpop.permute.xlu0 %2242 }
 0x47b   :  { %2305 = vpow2.f32 %v681_v33  ;;  %v2245_v46 = vunpack.i.h.bf16 %v2243_v23  ;;  %v2244_v36 = vunpack.i.l.bf16 %v2243_v23 }
 0x47d   :  { %v2994_v24 = vpop.eup %2301  ;;  %v908_v35 = vsel %vm897_vm2, %v2244_v36, %v2245_v46 }
 0x47e   :  { %709 = vadd.xlane.f32.xlu1 %v2994_v24  ;;  %v2078_v45 = vpack.c.bf16 %v909_v62, %v908_v35 }
 0x480   :  { %2079 = vmatprep.subr.bf16.mxu0 %v2078_v45 }
 0x481   :  { %v2999_v4 = vpop.eup %2303  ;;  %2081 = vmatpush3.bf16.msra.mxu0 %v2078_v45 }
 0x482   :  { %715 = vadd.xlane.f32.xlu0 %v2999_v4 }
 0x485   :  { %v3002_v38 = vpop.eup %2305 }
 0x486   :  { %713 = vadd.xlane.f32.xlu1 %v3002_v38 }
 0x498   :  { %v638_v54 = vpop.xlane.xlu1 %637 }
 0x499   :  { %v655_v51 = vsub.f32 %v2918_v52, %v638_v54 }
 0x49b   :  { %v685_v40 = vmul.f32 1.442695, %v655_v51 }
 0x49c   :  { %v2258_v63 = vpop.permute.xlu1 %2257 }
 0x49d   :  { %2307 = vpow2.f32 %v685_v40  ;;  %v2260_v9 = vunpack.i.h.bf16 %v2258_v63  ;;  %v2259_v12 = vunpack.i.l.bf16 %v2258_v63 }
 0x49f   :  { %v911_v1 = vsel %vm897_vm2, %v2259_v12, %v2260_v9 }
 0x4a0   :  { %v2268_v14 = vpop.permute.xlu1 %2267 }
 0x4a1   :  { %v2270_v32 = vunpack.i.h.bf16 %v2268_v14  ;;  %v2269_v52 = vunpack.i.l.bf16 %v2268_v14 }
 0x4a3   :  { %v913_v26 = vsel %vm897_vm2, %v2269_v52, %v2270_v32 }
 0x4a7   :  { %v3006_v10 = vpop.eup %2307 }
 0x4a8   :  { %717 = vadd.xlane.f32.xlu0 %v3006_v10 }
 0x4ab   :  { %v640_v42 = vpop.xlane.xlu0 %639 }
 0x4ac   :  { %v656_v7 = vsub.f32 %v2932_v53, %v640_v42 }
 0x4ae   :  { %v687_v60 = vmul.f32 1.442695, %v656_v7 }
 0x4af   :  { %v2253_v16 = vpop.permute.xlu0 %2252 }
 0x4b0   :  { %2309 = vpow2.f32 %v687_v60  ;;  %v2255_v17 = vunpack.i.h.bf16 %v2253_v16  ;;  %v2254_v27 = vunpack.i.l.bf16 %v2253_v16 }
 0x4b2   :  { %v910_v28 = vsel %vm897_vm2, %v2254_v27, %v2255_v17 }
 0x4b3   :  { %v2263_v21 = vpop.permute.xlu0 %2262  ;;  %v2082_v22 = vpack.c.bf16 %v911_v1, %v910_v28 }
 0x4b4   :  { %v2265_v0 = vunpack.i.h.bf16 %v2263_v21  ;;  %v2264_v37 = vunpack.i.l.bf16 %v2263_v21 }
 0x4b5   :  { %2083 = vmatprep.subr.bf16.mxu0 %v2082_v22 }
 0x4b6   :  { %2085 = vmatpush3.bf16.msra.mxu0 %v2082_v22  ;;  %v912_v53 = vsel %vm897_vm2, %v2264_v37, %v2265_v0 }
 0x4b7   :  { %v2086_v29 = vpack.c.bf16 %v913_v26, %v912_v53 }
 0x4b9   :  { %2087 = vmatprep.subr.bf16.mxu0 %v2086_v29 }
 0x4ba   :  { %v3014_v5 = vpop.eup %2309  ;;  %2089 = vmatpush3.bf16.msra.mxu0 %v2086_v29 }
 0x4bb   :  { %719 = vadd.xlane.f32.xlu1 %v3014_v5  ;;  %2091 = vmatprep.subr.bf16.mxu0 %v2090_v15 }
 0x4d1   :  { %v690_v6 = vpop.xlane.xlu1 %689 }
 0x4d2   :  { %2311 = vrcp.f32 %v690_v6 }
 0x4dc   :  { %v2312_v43 = vpop.eup %2311 }
 0x4dd   :  { %v737_v47 = vmul.f32 %v2312_v43, %v2948_v19  ;;  %v1093_v19 = vld [vmem:[%s3315_s1 + $0x148] sm:$0xff] }
 0x4de   :  { %v2098_v11 = vpack.c.bf16 %v1093_v19, %v1092_v2  ;;  %v1269_v19 = vld [vmem:[%s3315_s1 + $0x8] sm:$0xff] }
 0x4df   :  { %1956 = vmatprep.mubr.f32.mxu0 %v737_v47  ;;  %v2384_v47 = vld [vmem:[%s3314_s0] sm:$0xff] }
 0x4e4   :  { %v692_v39 = vpop.xlane.xlu0 %691 }
 0x4e5   :  { %2313 = vrcp.f32 %v692_v39 }
 0x4ef   :  { %v2314_v25 = vpop.eup %2313 }
 0x4f0   :  { %v738_v58 = vmul.f32 %v2314_v25, %v2952_v57 }
 0x4f2   :  { %1957 = vmatmul.mubr.f32.vlgmr.msra.gmra.mrb[0].mxu0 %v738_v58 }
 0x4f3   :  { %v696_v56 = vpop.xlane.xlu0 %695  ;;  %2093 = vmatpush3.bf16.msra.mxu0 %v2090_v15  ;;  %v2383_v15 = vld [vmem:[%s3314_s0 + $0x8] sm:$0xff] }
 0x4f4   :  { %2095 = vmatprep.subr.bf16.mxu0 %v2094_v59  ;;  %2315 = vrcp.f32 %v696_v56  ;;  %v1273_v56 = vld [vmem:[%s3315_s1 + $0x40] sm:$0xff] }
 0x4f7   :  { %v694_v61 = vpop.xlane.xlu1 %693  ;;  %2097 = vmatpush3.bf16.msra.mxu0 %v2094_v59 }
 0x4f8   :  { %2317 = vrcp.f32 %v694_v61  ;;  %v700_v33 = vpop.xlane.xlu0 %699  ;;  %2099 = vmatprep.subr.bf16.mxu0 %v2098_v11  ;;  %v2102_v61 = vpack.c.bf16 %v1273_v56, %v1269_v19 }
 0x4f9   :  { %2319 = vrcp.f32 %v700_v33  ;;  %v1275_v33 = vld [vmem:[%s3315_s1 + $0x50] sm:$0xff] }
 0x4fb   :  { %v698_v57 = vpop.xlane.xlu1 %697  ;;  %2101 = vmatpush3.bf16.msra.mxu0 %v2098_v11  ;;  %v1271_v11 = vld [vmem:[%s3315_s1 + $0x18] sm:$0xff] }
 0x4fc   :  { %2321 = vrcp.f32 %v698_v57  ;;  %v704_v23 = vpop.xlane.xlu0 %703  ;;  %v1268_v57 = vld [vmem:[%s3315_s1] sm:$0xff]  ;;  %2103 = vmatprep.subr.bf16.mxu0 %v2102_v61 }
 0x4fd   :  { %2323 = vrcp.f32 %v704_v23  ;;  %v1272_v23 = vld [vmem:[%s3315_s1 + $0x38] sm:$0xff] }
 0x4fe   :  { %v2316_v35 = vpop.eup %2315 }
 0x4ff   :  { %v702_v46 = vpop.xlane.xlu1 %701  ;;  %v740_v51 = vmul.f32 %v2316_v35, %v2962_v3  ;;  %v1270_v35 = vld [vmem:[%s3315_s1 + $0x10] sm:$0xff] }
 0x500   :  { %2325 = vrcp.f32 %v702_v46  ;;  %v708_v36 = vpop.xlane.xlu0 %707  ;;  %v2114_v46 = vpack.c.bf16 %v1275_v33, %v1271_v11 }
 0x501   :  { %2327 = vrcp.f32 %v708_v36  ;;  %v2104_v36 = vpack.c.bf16 %v1272_v23, %v1268_v57  ;;  %v1741_v57 = vld [vmem:[%s3316_s2 + $0x1c8] ss:$0 sm:$0xff] }
 0x502   :  { %v2318_v62 = vpop.eup %2317  ;;  %2115 = vmatprep.subr.bf16.mxu1 %v2114_v46 }
 0x503   :  { %v706_v45 = vpop.xlane.xlu1 %705  ;;  %v739_v54 = vmul.f32 %v2318_v62, %v2966_v30  ;;  %v2320_v40 = vpop.eup %2319  ;;  %v1274_v62 = vld [vmem:[%s3315_s1 + $0x48] sm:$0xff] }
 0x504   :  { %2329 = vrcp.f32 %v706_v45  ;;  %v742_v9 = vmul.f32 %v2320_v40, %v2968_v31  ;;  %v2116_v45 = vpack.c.bf16 %v1274_v62, %v1270_v35  ;;  %v1279_v40 = vld [vmem:[%s3315_s1 + $0x88] sm:$0xff] }
 0x505   :  { %1959 = vmatprep.mubr.f32.mxu0 %v739_v54  ;;  %v1277_v54 = vld [vmem:[%s3315_s1 + $0x78] sm:$0xff] }
 0x506   :  { %v2322_v63 = vpop.eup %2321  ;;  %1960 = vmatmul.mubr.f32.gmra.mrb[2].mxu0 %v740_v51  ;;  %v1281_v51 = vld [vmem:[%s3315_s1 + $0xb0] sm:$0xff]  ;;  %2117 = vmatpush1.bf16.msra.mxu1 %v2116_v45 }
 0x507   :  { %v741_v42 = vmul.f32 %v2322_v63, %v2973_v41  ;;  %v712_v7 = vpop.xlane.xlu0 %711  ;;  %v2324_v12 = vpop.eup %2323  ;;  %v2106_v63 = vpack.c.bf16 %v1281_v51, %v1277_v54 }
 0x508   :  { %2331 = vrcp.f32 %v712_v7  ;;  %v744_v3 = vmul.f32 %v2324_v12, %v2975_v48  ;;  %v1276_v7 = vld [vmem:[%s3315_s1 + $0x70] sm:$0xff] }
 0x509   :  { %1962 = vmatprep.mubr.f32.mxu0 %v741_v42  ;;  %v1283_v42 = vld [vmem:[%s3315_s1 + $0xc0] sm:$0xff] }
 0x50a   :  { %v2326_v60 = vpop.eup %2325  ;;  %1963 = vmatmul.mubr.f32.gmra.mrb[0].mxu0 %v742_v9  ;;  %v1280_v9 = vld [vmem:[%s3315_s1 + $0xa8] sm:$0xff]  ;;  %v2118_v12 = vpack.c.bf16 %v1283_v42, %v1279_v40 }
 0x50b   :  { %v710_v14 = vpop.xlane.xlu1 %709  ;;  %v743_v30 = vmul.f32 %v2326_v60, %v2980_v49  ;;  %v2328_v16 = vpop.eup %2327  ;;  %v2108_v60 = vpack.c.bf16 %v1280_v9, %v1276_v7 }
 0x50c   :  { %2333 = vrcp.f32 %v710_v14  ;;  %v746_v31 = vmul.f32 %v2328_v16, %v2982_v55  ;;  %v1278_v14 = vld [vmem:[%s3315_s1 + $0x80] sm:$0xff]  ;;  %2119 = vmatprep.subr.bf16.mxu1 %v2118_v12  ;;  %v1285_v16 = vld [vmem:[%s3315_s1 + $0xe8] sm:$0xff] }
 0x50d   :  { %1965 = vmatprep.mubr.f32.mxu0 %v743_v30  ;;  %v1282_v30 = vld [vmem:[%s3315_s1 + $0xb8] sm:$0xff] }
 0x50e   :  { %v2330_v17 = vpop.eup %2329  ;;  %1966 = vmatmul.mubr.f32.gmra.mrb[2].mxu0 %v744_v3  ;;  %v2120_v3 = vpack.c.bf16 %v1282_v30, %v1278_v14 }
 0x50f   :  { %v745_v41 = vmul.f32 %v2330_v17, %v2987_v18  ;;  %v716_v27 = vpop.xlane.xlu0 %715  ;;  %v1289_v17 = vld [vmem:[%s3315_s1 + $0x120] sm:$0xff] }
 0x510   :  { %2335 = vrcp.f32 %v716_v27  ;;  %2121 = vmatpush1.bf16.msra.mxu1 %v2120_v3  ;;  %v2110_v27 = vpack.c.bf16 %v1289_v17, %v1285_v16 }
 0x511   :  { %1968 = vmatprep.mubr.f32.mxu0 %v745_v41  ;;  %v1287_v41 = vld [vmem:[%s3315_s1 + $0xf8] sm:$0xff] }
 0x512   :  { %1969 = vmatmul.mubr.f32.gmra.mrb[0].mxu0 %v746_v31  ;;  %v2332_v52 = vpop.eup %2331  ;;  %v1291_v31 = vld [vmem:[%s3315_s1 + $0x130] sm:$0xff] }
 0x513   :  { %v714_v32 = vpop.xlane.xlu1 %713  ;;  %v748_v48 = vmul.f32 %v2332_v52, %v2991_v8  ;;  %v1288_v52 = vld [vmem:[%s3315_s1 + $0x118] sm:$0xff] }
 0x514   :  { %2337 = vrcp.f32 %v714_v32  ;;  %v1284_v32 = vld [vmem:[%s3315_s1 + $0xe0] sm:$0xff] }
 0x516   :  { %v2334_v28 = vpop.eup %2333 }
 0x517   :  { %v747_v49 = vmul.f32 %v2334_v28, %v2994_v24  ;;  %v2122_v28 = vpack.c.bf16 %v1291_v31, %v1287_v41 }
 0x519   :  { %1971 = vmatprep.mubr.f32.mxu0 %v747_v49  ;;  %v2112_v49 = vpack.c.bf16 %v1288_v52, %v1284_v32  ;;  %2123 = vmatprep.subr.bf16.mxu1 %v2122_v28 }
 0x51a   :  { %1972 = vmatmul.mubr.f32.gmra.mrb[2].mxu0 %v748_v48  ;;  %v2336_v1 = vpop.eup %2335  ;;  %v1286_v48 = vld [vmem:[%s3315_s1 + $0xf0] sm:$0xff] }
 0x51b   :  { %v750_v22 = vmul.f32 %v2336_v1, %v2999_v4  ;;  %v1290_v1 = vld [vmem:[%s3315_s1 + $0x128] sm:$0xff] }
 0x51e   :  { %v2338_v21 = vpop.eup %2337 }
 0x51f   :  { %v749_v18 = vmul.f32 %v2338_v21, %v3002_v38  ;;  %v2124_v21 = vpack.c.bf16 %v1290_v1, %v1286_v48  ;;  %v1546_v1 = vld [vmem:[%s3316_s2 + $0x100] sm:$0xff] }
 0x521   :  { %1974 = vmatprep.mubr.f32.mxu0 %v749_v18  ;;  %2125 = vmatpush1.bf16.msra.mxu1 %v2124_v21  ;;  %v1547_v21 = vld [vmem:[%s3316_s2 + $0x108] sm:$0xff] }
 0x522   :  { %1975 = vmatmul.mubr.f32.gmra.mrb[0].mxu0 %v750_v22 }
 0x535   :  { %v718_v55 = vpop.xlane.xlu0 %717 }
 0x536   :  { %2339 = vrcp.f32 %v718_v55 }
 0x540   :  { %v2340_v0 = vpop.eup %2339 }
 0x541   :  { %v751_v37 = vmul.f32 %v2340_v0, %v3006_v10  ;;  %v3059_v10 = vld [vmem:[%s3316_s2 + $0x1d0] ss:$0 sm:$0xff] }
 0x543   :  { %1977 = vmatprep.mubr.f32.mxu0 %v751_v37  ;;  %v2385_v37 = vld [vmem:[%s3314_s0 + $0x18] sm:$0xff] }
 0x548   :  { %v720_v53 = vpop.xlane.xlu1 %719 }
 0x549   :  { %2341 = vrcp.f32 %v720_v53 }
 0x553   :  { %v2342_v24 = vpop.eup %2341 }
 0x554   :  { %v752_v8 = vmul.f32 %v2342_v24, %v3014_v5  ;;  %v2386_v24 = vld [vmem:[%s3314_s0 + $0x10] sm:$0xff] }
 0x556   :  { %1978 = vmatmul.mubr.f32.gmra.mrb[2].mxu0 %v752_v8 }
 0x5f5   :  { %v1976_v26 = vpop.f32.mrb[0].mxu0 }
 0x5f6   :  { %v1056_v29 = vpop.f32.mrb[1].mxu0 }
 0x5f7   :  { %1992 = vmatprep.mubr.msk.f32.mxu0 %vm20_vm0, %v1056_v29 }
 0x5f8   :  { %1993 = vmatmul.mubr.msk.f32.vlgmr.msra.gmra.mrb[4].mxu0 %vm20_vm0, %v1976_v26 }
 0x5f9   :  { %2105 = vmatpush1.bf16.msra.mxu0 %v2104_v36 }
 0x5fa   :  { %2107 = vmatprep.subr.bf16.mxu0 %v2106_v63 }
 0x5fd   :  { %2109 = vmatpush1.bf16.msra.mxu0 %v2108_v60 }
 0x5fe   :  { %2111 = vmatprep.subr.bf16.mxu0 %v2110_v27 }
 0x601   :  { %2113 = vmatpush1.bf16.msra.mxu0 %v2112_v49 }
 0x629   :  { %v1979_v4 = vpop.f32.mrb[2].mxu0 }
 0x62a   :  { %v1066_v38 = vpop.f32.mrb[3].mxu0 }
 0x62b   :  { %1995 = vmatprep.mubr.msk.f32.mxu0 %vm20_vm0, %v1066_v38 }
 0x62c   :  { %1996 = vmatmul.mubr.msk.f32.gmra.mrb[6].mxu0 %vm20_vm0, %v1979_v4 }
 0x62d   :  { %1368 = vmatprep.mubr.f32.mxu0 %v2411_v34 }
 0x6cb   :  { %v1994_v5 = vpop.f32.mrb[4].mxu0 }
 0x6cc   :  { %v1182_v6 = vadd.f32 %v1994_v5, %v3059_v10  ;;  %v1176_v44 = vpop.f32.mrb[5].mxu0 }
 0x6cd   :  { %v1177_v13 = vadd.f32 %v3059_v10, %v1176_v44 }
 0x6ce   :  { %v3066_v43 = vadd.f32 %v2383_v15, %v1182_v6 }
 0x6cf   :  { %v3071_v39 = vadd.f32 %v2384_v47, %v1177_v13 }
 0x6d0   :  { %v1217_v58 = vmul.f32 %v3066_v43, %v3066_v43  ;;  %v1203_v59 = vsel %vm20_vm0, %v3066_v43, 0.0 }
 0x6d1   :  { %v1200_v50 = vsel %vm20_vm0, %v3071_v39, 0.0  ;;  %v1216_v20 = vmul.f32 %v3071_v39, %v3071_v39 }
 0x6d2   :  { %1201 = vadd.xlane.f32.xlu0 %v1200_v50  ;;  %v1223_v2 = vsel %vm20_vm0, %v1217_v58, 0.0 }
 0x6d3   :  { %v1220_v25 = vsel %vm20_vm0, %v1216_v20, 0.0 }
 0x6d4   :  { %1221 = vadd.xlane.f32.xlu1 %v1220_v25 }
 0x6d6   :  { %1204 = vadd.xlane.f32.xlu0 %v1203_v59 }
 0x6d8   :  { %1224 = vadd.xlane.f32.xlu1 %v1223_v2 }
 0x6ff   :  { %v1997_v18 = vpop.f32.mrb[6].mxu0 }
 0x700   :  { %v1192_v22 = vadd.f32 %v1997_v18, %v3059_v10  ;;  %v1186_v55 = vpop.f32.mrb[7].mxu0  ;;  %v2126_v18 = vpack.c.bf16 %v1547_v21, %v1546_v1 }
 0x701   :  { %v1187_v0 = vadd.f32 %v3059_v10, %v1186_v55 }
 0x702   :  { %v3160_v53 = vadd.f32 %v2385_v37, %v1192_v22  ;;  %v1530_v22 = vld [vmem:[%s3316_s2 + $0x80] sm:$0xff]  ;;  %2127 = vmatprep.subr.bf16.mxu0 %v2126_v18  ;;  %v1549_v37 = vld [vmem:[%s3316_s2 + $0x118] sm:$0xff] }
 0x703   :  { %v3165_v8 = vadd.f32 %v2386_v24, %v1187_v0  ;;  %v1548_v0 = vld [vmem:[%s3316_s2 + $0x110] sm:$0xff] }
 0x704   :  { %v1219_v38 = vmul.f32 %v3160_v53, %v3160_v53  ;;  %v1209_v10 = vsel %vm20_vm0, %v3160_v53, 0.0  ;;  %v2130_v24 = vpack.c.bf16 %v1549_v37, %v1548_v0 }
 0x705   :  { %v1206_v26 = vsel %vm20_vm0, %v3165_v8, 0.0  ;;  %v1218_v29 = vmul.f32 %v3165_v8, %v3165_v8 }
 0x706   :  { %1207 = vadd.xlane.f32.xlu0 %v1206_v26  ;;  %v1229_v5 = vsel %vm20_vm0, %v1219_v38, 0.0  ;;  %v1532_v26 = vld [vmem:[%s3316_s2 + $0x90] sm:$0xff]  ;;  %v1550_v38 = vld [vmem:[%s3316_s2 + $0x120] sm:$0xff] }
 0x707   :  { %v1226_v4 = vsel %vm20_vm0, %v1218_v29, 0.0  ;;  %v1533_v29 = vld [vmem:[%s3316_s2 + $0x98] sm:$0xff] }
 0x708   :  { %1227 = vadd.xlane.f32.xlu1 %v1226_v4  ;;  %v2132_v4 = vpack.c.bf16 %v1533_v29, %v1532_v26 }
 0x70a   :  { %1210 = vadd.xlane.f32.xlu0 %v1209_v10  ;;  %v1551_v10 = vld [vmem:[%s3316_s2 + $0x128] sm:$0xff] }
 0x70c   :  { %1230 = vadd.xlane.f32.xlu1 %v1229_v5  ;;  %v2134_v5 = vpack.c.bf16 %v1551_v10, %v1550_v38 }
 0x75f   :  { %v1202_v6 = vpop.xlane.xlu0 %1201 }
 0x760   :  { %v1212_v44 = vmul.f32 0.020833334, %v1202_v6  ;;  %v1534_v6 = vld [vmem:[%s3316_s2 + $0xa0] sm:$0xff] }
 0x761   :  { %v1222_v13 = vpop.xlane.xlu1 %1221 }
 0x762   :  { %v1240_v15 = vmul.f32 %v1212_v44, %v1212_v44  ;;  %v1232_v47 = vmul.f32 0.020833334, %v1222_v13  ;;  %v1236_v61 = vsub.f32 %v3071_v39, %v1212_v44  ;;  %v1535_v44 = vld [vmem:[%s3316_s2 + $0xa8] sm:$0xff] }
 0x763   :  { %v1205_v50 = vpop.xlane.xlu0 %1204  ;;  %v2136_v13 = vpack.c.bf16 %v1535_v44, %v1534_v6 }
 0x764   :  { %v1244_v20 = vsub.f32 %v1232_v47, %v1240_v15  ;;  %v1213_v25 = vmul.f32 0.020833334, %v1205_v50  ;;  %v1552_v15 = vld [vmem:[%s3316_s2 + $0x130] sm:$0xff]  ;;  %v1553_v47 = vld [vmem:[%s3316_s2 + $0x138] sm:$0xff] }
 0x765   :  { %v1225_v58 = vpop.xlane.xlu1 %1224  ;;  %v2138_v50 = vpack.c.bf16 %v1553_v47, %v1552_v15 }
 0x766   :  { %v1248_v59 = vadd.f32 1e-05, %v1244_v20  ;;  %v1241_v2 = vmul.f32 %v1213_v25, %v1213_v25  ;;  %v1233_v19 = vmul.f32 0.020833334, %v1225_v58  ;;  %v1237_v36 = vsub.f32 %v3066_v43, %v1213_v25  ;;  %v1536_v20 = vld [vmem:[%s3316_s2 + $0xb0] sm:$0xff]  ;;  %v1537_v25 = vld [vmem:[%s3316_s2 + $0xb8] sm:$0xff] }
 0x767   :  { %v2140_v58 = vpack.c.bf16 %v1537_v25, %v1536_v20 }
 0x768   :  { %2343 = vrsqrt.f32 %v1248_v59  ;;  %v1245_v56 = vsub.f32 %v1233_v19, %v1241_v2  ;;  %v1554_v59 = vld [vmem:[%s3316_s2 + $0x140] sm:$0xff]  ;;  %v1555_v2 = vld [vmem:[%s3316_s2 + $0x148] sm:$0xff] }
 0x769   :  { %v2142_v19 = vpack.c.bf16 %v1555_v2, %v1554_v59 }
 0x76a   :  { %v1249_v11 = vadd.f32 1e-05, %v1245_v56  ;;  %v1538_v56 = vld [vmem:[%s3316_s2 + $0xc0] sm:$0xff] }
 0x76c   :  { %2345 = vrsqrt.f32 %v1249_v11  ;;  %v1539_v11 = vld [vmem:[%s3316_s2 + $0xc8] sm:$0xff] }
 0x772   :  { %v2344_v33 = vpop.eup %2343 }
 0x773   :  { %v1256_v23 = vmul.f32 %v2344_v33, %v1236_v61  ;;  %v2144_v61 = vpack.c.bf16 %v1539_v11, %v1538_v56  ;;  %v1556_v33 = vld [vmem:[%s3316_s2 + $0x150] sm:$0xff] }
 0x775   :  { %v1264_v46 = vmul.f32 %v1741_v57, %v1256_v23 }
 0x776   :  { %v2346_v35 = vpop.eup %2345 }
 0x777   :  { %1742 = vmatmul.mubr.msk.f32.vlgmr.msra.gmra.mrb[8].mxu0 %vm20_vm0, %v1264_v46  ;;  %1746 = vmatmul.mubr.msk.f32.vlgmr.msra.gmra.mrb[24].mxu1 %vm20_vm0, %v1264_v46  ;;  %v1257_v62 = vmul.f32 %v2346_v35, %v1237_v36  ;;  %v1540_v46 = vld [vmem:[%s3316_s2 + $0xd0] sm:$0xff]  ;;  %v1541_v36 = vld [vmem:[%s3316_s2 + $0xd8] sm:$0xff] }
 0x778   :  { %1374 = vmatprep.mubr.f32.mxu0 %v2411_v34  ;;  %1463 = vmatprep.mubr.f32.mxu1 %v2411_v34  ;;  %v2148_v35 = vpack.c.bf16 %v1541_v36, %v1540_v46 }
 0x779   :  { %v1265_v45 = vmul.f32 %v1741_v57, %v1257_v62  ;;  %v1558_v62 = vld [vmem:[%s3316_s2 + $0x160] sm:$0xff] }
 0x77b   :  { %1743 = vmatmul.mubr.msk.f32.gmra.mrb[10].mxu0 %vm20_vm0, %v1265_v45  ;;  %1747 = vmatmul.mubr.msk.f32.gmra.mrb[26].mxu1 %vm20_vm0, %v1265_v45  ;;  %v1559_v45 = vld [vmem:[%s3316_s2 + $0x168] sm:$0xff] }
 0x77c   :  { %1380 = vmatprep.mubr.f32.mxu0 %v2411_v34  ;;  %1469 = vmatprep.mubr.f32.mxu1 %v2411_v34 }
 0x793   :  { %v1208_v54 = vpop.xlane.xlu0 %1207 }
 0x794   :  { %v1214_v51 = vmul.f32 0.020833334, %v1208_v54  ;;  %v2150_v54 = vpack.c.bf16 %v1559_v45, %v1558_v62 }
 0x795   :  { %v1228_v40 = vpop.xlane.xlu1 %1227 }
 0x796   :  { %v1242_v63 = vmul.f32 %v1214_v51, %v1214_v51  ;;  %v1234_v42 = vmul.f32 0.020833334, %v1228_v40  ;;  %v1238_v41 = vsub.f32 %v3165_v8, %v1214_v51  ;;  %v1542_v51 = vld [vmem:[%s3316_s2 + $0xe0] sm:$0xff]  ;;  %v1543_v40 = vld [vmem:[%s3316_s2 + $0xe8] sm:$0xff] }
 0x797   :  { %v1211_v7 = vpop.xlane.xlu0 %1210 }
 0x798   :  { %v1246_v9 = vsub.f32 %v1234_v42, %v1242_v63  ;;  %v1215_v12 = vmul.f32 0.020833334, %v1211_v7  ;;  %v2152_v63 = vpack.c.bf16 %v1543_v40, %v1542_v51  ;;  %v1560_v42 = vld [vmem:[%s3316_s2 + $0x170] sm:$0xff]  ;;  %v1561_v7 = vld [vmem:[%s3316_s2 + $0x178] sm:$0xff] }
 0x799   :  { %v1231_v60 = vpop.xlane.xlu1 %1230 }
 0x79a   :  { %v1250_v14 = vadd.f32 1e-05, %v1246_v9  ;;  %v1243_v30 = vmul.f32 %v1215_v12, %v1215_v12  ;;  %v1235_v3 = vmul.f32 0.020833334, %v1231_v60  ;;  %v1239_v32 = vsub.f32 %v3160_v53, %v1215_v12  ;;  %v1544_v12 = vld [vmem:[%s3316_s2 + $0xf0] sm:$0xff]  ;;  %v1545_v60 = vld [vmem:[%s3316_s2 + $0xf8] sm:$0xff] }
 0x79b   :  { %v2154_v9 = vpack.c.bf16 %v1561_v7, %v1560_v42 }
 0x79c   :  { %2347 = vrsqrt.f32 %v1250_v14  ;;  %v1247_v16 = vsub.f32 %v1235_v3, %v1243_v30  ;;  %v2156_v14 = vpack.c.bf16 %v1545_v60, %v1544_v12 }
 0x79e   :  { %v1251_v17 = vadd.f32 1e-05, %v1247_v16 }
 0x7a0   :  { %2349 = vrsqrt.f32 %v1251_v17 }
 0x7a6   :  { %v2348_v27 = vpop.eup %2347 }
 0x7a7   :  { %v1258_v31 = vmul.f32 %v2348_v27, %v1238_v41 }
 0x7a9   :  { %v1266_v52 = vmul.f32 %v1741_v57, %v1258_v31 }
 0x7aa   :  { %v2350_v28 = vpop.eup %2349 }
 0x7ab   :  { %1744 = vmatmul.mubr.msk.f32.gmra.mrb[12].mxu0 %vm20_vm0, %v1266_v52  ;;  %1748 = vmatmul.mubr.msk.f32.gmra.mrb[28].mxu1 %vm20_vm0, %v1266_v52  ;;  %v1259_v49 = vmul.f32 %v2350_v28, %v1239_v32 }
 0x7ac   :  { %1386 = vmatprep.mubr.f32.mxu0 %v2411_v34  ;;  %1475 = vmatprep.mubr.f32.mxu1 %v2411_v34  ;;  %v1531_v34 = vld [vmem:[%s3316_s2 + $0x88] sm:$0xff] }
 0x7ad   :  { %v1267_v48 = vmul.f32 %v1741_v57, %v1259_v49  ;;  %v2128_v55 = vpack.c.bf16 %v1531_v34, %v1530_v22  ;;  %v1557_v57 = vld [vmem:[%s3316_s2 + $0x158] sm:$0xff]  ;;  %s2419_s2 = smov [#allocation2]  }
 0x7ae   :  { %v2146_v23 = vpack.c.bf16 %v1557_v57, %v1556_v33  ;;  %s1672_s18 = sshll.u32 %s2419_s2, 4  ;;  %s1673_s18 = int_to_ptr.vmem [resolvable:$true] %s1672_s18 }
 0x7af   :  { %1745 = vmatmul.mubr.msk.f32.gmra.mrb[14].mxu0 %vm20_vm0, %v1267_v48  ;;  %1749 = vmatmul.mubr.msk.f32.gmra.mrb[30].mxu1 %vm20_vm0, %v1267_v48  ;;  %s2387_s19 = scalar_lea.vmem %s1673_s18, 512  ;;  %p2392_p1 = scmp.lt.s32.totalorder %s1673_s18, %s1673_s18 }
 0x7b0   :  { %2129 = vmatpush3.bf16.msra.mxu0 %v2128_v55  ;;  %p2388_p0 = scmp.ne.s32.totalorder %s1673_s18, %s2387_s19  ;;  %p2393_p2 = scmp.lt.s32.totalorder %s2387_s19, %s2387_s19 }
 0x7b1   :  { %2131 = vmatprep.subr.bf16.mxu0 %v2130_v24 }
 0x7b2   :  { %p2394_p3 = por %p2393_p2, %p2392_p1 }
 0x7b4   :  { %2133 = vmatpush3.bf16.msra.mxu0 %v2132_v4  ;;  %p2395_p4 = pnand %p2394_p3, %p2388_p0 }
 0x7b5   :  { %2135 = vmatprep.subr.bf16.mxu0 %v2134_v5 }
 0x7b8   :  { %2137 = vmatpush3.bf16.msra.mxu0 %v2136_v13 }
 0x7b9   :  { %2139 = vmatprep.subr.bf16.mxu0 %v2138_v50 }
 0x7bc   :  { %2141 = vmatpush3.bf16.msra.mxu0 %v2140_v58 }
 0x7bd   :  { %2143 = vmatprep.subr.bf16.mxu0 %v2142_v19 }
 0x7c0   :  { %2145 = vmatpush3.bf16.msra.mxu0 %v2144_v61 }
 0x7c1   :  { %2147 = vmatprep.subr.bf16.mxu0 %v2146_v23 }
 0x7c4   :  { %2149 = vmatpush3.bf16.msra.mxu0 %v2148_v35 }
 0x7c5   :  { %2151 = vmatprep.subr.bf16.mxu0 %v2150_v54 }
 0x7c8   :  { %2153 = vmatpush3.bf16.msra.mxu0 %v2152_v63 }
 0x7c9   :  { %2155 = vmatprep.subr.bf16.mxu0 %v2154_v9 }
 0x7cc   :  { %2157 = vmatpush3.bf16.msra.mxu0 %v2156_v14 }
 0x84a   :  { %v1370_v30 = vpop.f32.mrb[8].mxu0  ;;  %v1459_v3 = vpop.f32.mrb[24].mxu1 }
 0x84b   :  { %v1482_v16 = vsub.f32 0.0, %v1459_v3  ;;  %v1372_v17 = vpop.f32.mrb[9].mxu0  ;;  %v1461_v41 = vpop.f32.mrb[25].mxu1 }
 0x84c   :  { %v1483_v27 = vsub.f32 0.0, %v1461_v41 }
 0x84d   :  { %v1490_v31 = vmul.f32 1.442695, %v1482_v16 }
 0x84e   :  { %v1492_v32 = vmul.f32 1.442695, %v1483_v27  ;;  %v1376_v52 = vpop.f32.mrb[10].mxu0  ;;  %v1465_v28 = vpop.f32.mrb[26].mxu1 }
 0x84f   :  { %2351 = vpow2.f32 %v1490_v31  ;;  %v1484_v49 = vsub.f32 0.0, %v1465_v28  ;;  %v1378_v48 = vpop.f32.mrb[11].mxu0  ;;  %v1467_v1 = vpop.f32.mrb[27].mxu1 }
 0x850   :  { %2353 = vpow2.f32 %v1492_v32  ;;  %v1485_v21 = vsub.f32 0.0, %v1467_v1 }
 0x851   :  { %v1494_v18 = vmul.f32 1.442695, %v1484_v49 }
 0x852   :  { %v1496_v22 = vmul.f32 1.442695, %v1485_v21 }
 0x853   :  { %2355 = vpow2.f32 %v1494_v18 }
 0x854   :  { %2357 = vpow2.f32 %v1496_v22 }
 0x859   :  { %v2352_v34 = vpop.eup %2351 }
 0x85a   :  { %v2354_v55 = vpop.eup %2353  ;;  %v1506_v0 = vadd.f32 1.0, %v2352_v34 }
 0x85b   :  { %v1507_v37 = vadd.f32 1.0, %v2354_v55 }
 0x85c   :  { %2359 = vrcp.f32 %v1506_v0 }
 0x85d   :  { %v2356_v24 = vpop.eup %2355  ;;  %2361 = vrcp.f32 %v1507_v37 }
 0x85e   :  { %v2358_v26 = vpop.eup %2357  ;;  %v1508_v29 = vadd.f32 1.0, %v2356_v24 }
 0x85f   :  { %v1509_v4 = vadd.f32 1.0, %v2358_v26 }
 0x860   :  { %2363 = vrcp.f32 %v1508_v29 }
 0x861   :  { %2365 = vrcp.f32 %v1509_v4 }
 0x866   :  { %v2360_v38 = vpop.eup %2359 }
 0x867   :  { %v2362_v10 = vpop.eup %2361  ;;  %v1522_v5 = vmul.f32 %v2360_v38, %v1459_v3 }
 0x868   :  { %v1523_v6 = vmul.f32 %v2362_v10, %v1461_v41 }
 0x869   :  { %v1562_v44 = vmul.f32 %v1522_v5, %v1370_v30 }
 0x86a   :  { %v2364_v13 = vpop.eup %2363  ;;  %v1563_v15 = vmul.f32 %v1523_v6, %v1372_v17 }
 0x86b   :  { %v2366_v47 = vpop.eup %2365  ;;  %v1524_v50 = vmul.f32 %v2364_v13, %v1465_v28 }
 0x86c   :  { %v1525_v20 = vmul.f32 %v2366_v47, %v1467_v1  ;;  %1634 = vmatprep.mubr.f32.mxu0 %v1563_v15 }
 0x86d   :  { %v1564_v25 = vmul.f32 %v1524_v50, %v1376_v52  ;;  %1635 = vmatmul.mubr.f32.vlgmr.msra.gmra.mrb[16].mxu0 %v1562_v44 }
 0x86e   :  { %v1565_v58 = vmul.f32 %v1525_v20, %v1378_v48 }
 0x870   :  { %1639 = vmatprep.mubr.f32.mxu0 %v1565_v58 }
 0x871   :  { %1640 = vmatmul.mubr.f32.gmra.mrb[18].mxu0 %v1564_v25 }
 0x87e   :  { %v1382_v59 = vpop.f32.mrb[12].mxu0  ;;  %v1471_v2 = vpop.f32.mrb[28].mxu1 }
 0x87f   :  { %v1486_v19 = vsub.f32 0.0, %v1471_v2  ;;  %v1384_v56 = vpop.f32.mrb[13].mxu0  ;;  %v1473_v11 = vpop.f32.mrb[29].mxu1 }
 0x880   :  { %v1487_v61 = vsub.f32 0.0, %v1473_v11 }
 0x881   :  { %v1498_v33 = vmul.f32 1.442695, %v1486_v19 }
 0x882   :  { %v1500_v57 = vmul.f32 1.442695, %v1487_v61  ;;  %v1388_v23 = vpop.f32.mrb[14].mxu0  ;;  %v1477_v46 = vpop.f32.mrb[30].mxu1 }
 0x883   :  { %2367 = vpow2.f32 %v1498_v33  ;;  %v1488_v36 = vsub.f32 0.0, %v1477_v46  ;;  %v1390_v35 = vpop.f32.mrb[15].mxu0  ;;  %v1479_v62 = vpop.f32.mrb[31].mxu1 }
 0x884   :  { %2369 = vpow2.f32 %v1500_v57  ;;  %v1489_v45 = vsub.f32 0.0, %v1479_v62 }
 0x885   :  { %v1502_v54 = vmul.f32 1.442695, %v1488_v36 }
 0x886   :  { %v1504_v51 = vmul.f32 1.442695, %v1489_v45 }
 0x887   :  { %2371 = vpow2.f32 %v1502_v54 }
 0x888   :  { %2373 = vpow2.f32 %v1504_v51 }
 0x88d   :  { %v2368_v40 = vpop.eup %2367 }
 0x88e   :  { %v2370_v63 = vpop.eup %2369  ;;  %v1510_v42 = vadd.f32 1.0, %v2368_v40 }
 0x88f   :  { %v1511_v7 = vadd.f32 1.0, %v2370_v63 }
 0x890   :  { %2375 = vrcp.f32 %v1510_v42 }
 0x891   :  { %v2372_v9 = vpop.eup %2371  ;;  %2377 = vrcp.f32 %v1511_v7 }
 0x892   :  { %v2374_v12 = vpop.eup %2373  ;;  %v1512_v60 = vadd.f32 1.0, %v2372_v9 }
 0x893   :  { %v1513_v14 = vadd.f32 1.0, %v2374_v12 }
 0x894   :  { %2379 = vrcp.f32 %v1512_v60 }
 0x895   :  { %2381 = vrcp.f32 %v1513_v14 }
 0x89a   :  { %v2376_v30 = vpop.eup %2375 }
 0x89b   :  { %v2378_v3 = vpop.eup %2377  ;;  %v1526_v16 = vmul.f32 %v2376_v30, %v1471_v2 }
 0x89c   :  { %v1527_v17 = vmul.f32 %v2378_v3, %v1473_v11 }
 0x89d   :  { %v1566_v41 = vmul.f32 %v1526_v16, %v1382_v59 }
 0x89e   :  { %v2380_v27 = vpop.eup %2379  ;;  %v1567_v31 = vmul.f32 %v1527_v17, %v1384_v56 }
 0x89f   :  { %v2382_v32 = vpop.eup %2381  ;;  %v1528_v52 = vmul.f32 %v2380_v27, %v1477_v46 }
 0x8a0   :  { %v1529_v28 = vmul.f32 %v2382_v32, %v1479_v62  ;;  %1644 = vmatprep.mubr.f32.mxu0 %v1567_v31 }
 0x8a1   :  { %v1568_v49 = vmul.f32 %v1528_v52, %v1388_v23  ;;  %1645 = vmatmul.mubr.f32.gmra.mrb[20].mxu0 %v1566_v41 }
 0x8a2   :  { %v1569_v48 = vmul.f32 %v1529_v28, %v1390_v35 }
 0x8a4   :  { %1649 = vmatprep.mubr.f32.mxu0 %v1569_v48 }
 0x8a5   :  { %1650 = vmatmul.mubr.f32.gmra.mrb[22].mxu0 %v1568_v49 }
 0x940   :  { %v1856_v1 = vpop.f32.mrb[16].mxu0 }
 0x941   :  { %v1857_v21 = vpop.f32.mrb[17].mxu0 }
 0x942   :  { %v1858_v18 = vadd.f32 %v1857_v21, %v1856_v1 }
 0x944   :  { %v1655_v22 = vadd.f32 %v1858_v18, %v3071_v39  ;;  %v1859_v34 = vpop.f32.mrb[18].mxu0 }
 0x945   :  { %v1860_v55 = vpop.f32.mrb[19].mxu0 }
 0x946   :  { %v1659_v0 = vsel %vm20_vm0, %v1655_v22, 0.0  ;;  %v1861_v37 = vadd.f32 %v1860_v55, %v1859_v34 }
 0x947   :  { %1663 = vst [vmem:[#allocation2] sm:$0xff] %v1659_v0 }
 0x948   :  { %v1656_v24 = vadd.f32 %v1861_v37, %v3066_v43 }
 0x94a   :  { %v1660_v26 = vsel %vm20_vm0, %v1656_v24, 0.0 }
 0x94b   :  { %1664 = vst [vmem:[#allocation2 + $0x8] sm:$0xff] %v1660_v26 }
 0x974   :  { %v1862_v29 = vpop.f32.mrb[20].mxu0 }
 0x975   :  { %v1863_v4 = vpop.f32.mrb[21].mxu0 }
 0x976   :  { %v1864_v38 = vadd.f32 %v1863_v4, %v1862_v29 }
 0x978   :  { %v1657_v10 = vadd.f32 %v1864_v38, %v3165_v8  ;;  %v1865_v5 = vpop.f32.mrb[22].mxu0 }
 0x979   :  { %v1866_v6 = vpop.f32.mrb[23].mxu0 }
 0x97a   :  { %v1661_v39 = vsel %vm20_vm0, %v1657_v10, 0.0  ;;  %v1867_v44 = vadd.f32 %v1866_v6, %v1865_v5 }
 0x97b   :  { %1665 = vst [vmem:[#allocation2 + $0x10] sm:$0xff] %v1661_v39 }
 0x97c   :  { %v1658_v13 = vadd.f32 %v1867_v44, %v3160_v53 }
 0x97e   :  { %v1662_v43 = vsel %vm20_vm0, %v1658_v13, 0.0 }
 0x97f   :  { %1666 = vst [vmem:[#allocation2 + $0x18] sm:$0xff] %v1662_v43 }
 0x980   :  { %2398 = shalt.err (!%p2395_p4)
}
 0x981   :  { %s2399_s22 = scalar_lea.hbm %s3317_s3, 512 }
 0x982   :  { %p2400_p5 = scmp.ne.s32.totalorder %s3317_s3, %s2399_s22  ;;  %p2403_p6 = scmp.lt.u32.totalorder %s2399_s22, %s3317_s3 }
 0x984   :  { %p2405_p7 = pnand %p2403_p6, %p2400_p5 }
 0x986   :  { %2408 = shalt.err (!%p2405_p7)
}
 0x987   :  { %s2420_s26 = smov 128   ;;  %s2421_s27 = smov 8  }
 0x988   :  { %1678 = dma.vmem_to_hbm [thread:$0]  %s1673_s18, 512, %s3317_s3, [#allocation3], %s2420_s26, %s2420_s26, %s2421_s27  }
 0x989   :  { %2409 = dma.done.wait [#allocation3], 512  }
 0x98a   :  { %2410 = vsyncadd [#allocation3], 4294966784 }
 0x98b   :  { %1682 = vsyncpa [#allocation3], 1 }

</bundles_post_ra>
